<compile_context>
chip_gen: v5e
topology: v5e:2x2
jax: 0.10.0
libtpu: 0.0.40
codegen_flags: <defaults>
</compile_context>

<pallas_src>
import functools
import math

import jax
import jax.numpy as jnp
from jax import lax
from jax.experimental import pallas as pl
from jax.experimental.pallas import tpu as pltpu

EPS = 1e-5  # BatchNorm1d / LayerNorm default eps


def _layernorm(h, g, b):
    mu = jnp.mean(h, axis=-1, keepdims=True)
    var = jnp.mean(jnp.square(h - mu), axis=-1, keepdims=True)
    return (h - mu) * lax.rsqrt(var + EPS) * g + b


# ----------------------------- fused Pallas kernel ---------------------------

def fused_forward_kernel(x_ref, emb_w_ref, emb_small_ref,
                         wqkv_ref, wo_ref, wff1_ref, wff2_ref, small_ref,
                         fc_ref, o_ref, h_ref, *, num_heads, num_players):
    """One grid step = one transformer layer; h_ref (M,D) persists across steps."""
    layer = pl.program_id(0)
    num_layers = pl.num_programs(0)

    M, D = h_ref.shape
    P = num_players
    B = M // P                       # rows are player-major: r = p*B + b
    H = num_heads
    dh = D // H
    bf16 = jnp.bfloat16
    f32 = jnp.float32

    # --- phase 0: BatchNorm(folded) + embedding Linear + ReLU + LayerNorm ---
    @pl.when(layer == 0)
    def _():
        es = emb_small_ref[...]                                   # (3, D): b', ln_g, ln_b
        h0 = jnp.dot(x_ref[...].astype(bf16), emb_w_ref[...],
                     preferred_element_type=f32) + es[0:1, :]
        h0 = jnp.maximum(h0, 0.0)
        h_ref[...] = _layernorm(h0, es[1:2, :], es[2:3, :])

    # --- one post-norm encoder layer with this step's streamed weights ---
    sm = small_ref[0]                                             # (8, 4D) packed params
    b_qkv = sm[0:1, :3 * D]                                       # (q-part already scaled)
    b_o = sm[1:2, :D]
    ln1_g, ln1_b = sm[2:3, :D], sm[3:4, :D]
    b_ff1 = sm[4:5, :]
    b_ff2 = sm[5:6, :D]
    ln2_g, ln2_b = sm[6:7, :D], sm[7:8, :D]

    hcur = h_ref[...]                                             # (M, D) f32
    qkv = jnp.dot(hcur.astype(bf16), wqkv_ref[0],
                  preferred_element_type=f32) + b_qkv             # (M, 3D)

    # Block-diagonal attention: one dense BxB block per player (no mask needed).
    # P and H are small & static -> Python unroll; heads written back at their lane
    # offsets via concatenate, then a single full-D output projection.
    player_blocks = []
    for p in range(P):
        rows = slice(p * B, (p + 1) * B)
        heads = []
        for hh in range(H):
            q = qkv[rows, hh * dh:(hh + 1) * dh]                  # (B, dh)
            k = qkv[rows, D + hh * dh:D + (hh + 1) * dh]
            v = qkv[rows, 2 * D + hh * dh:2 * D + (hh + 1) * dh]
            s = lax.dot_general(q, k, (((1,), (1,)), ((), ())),
                                preferred_element_type=f32)       # (B, B)
            m = jnp.max(s, axis=-1, keepdims=True)
            e = jnp.exp(s - m)
            e = e * pl.reciprocal(jnp.sum(e, axis=-1, keepdims=True), approx=True)
            heads.append(jnp.dot(e.astype(bf16), v.astype(bf16),
                                 preferred_element_type=f32))     # (B, dh)
        player_blocks.append(jnp.concatenate(heads, axis=-1))     # (B, D)
    attn = jnp.concatenate(player_blocks, axis=0)                 # (M, D)
    attn = jnp.dot(attn.astype(bf16), wo_ref[0],
                   preferred_element_type=f32) + b_o              # single (D,D) proj

    h1 = _layernorm(hcur + attn, ln1_g, ln1_b)                    # norm1(x + attn)
    ff = jnp.maximum(jnp.dot(h1.astype(bf16), wff1_ref[0],
                             preferred_element_type=f32) + b_ff1, 0.0)
    ff = jnp.dot(ff.astype(bf16), wff2_ref[0],
                 preferred_element_type=f32) + b_ff2
    hnew = _layernorm(h1 + ff, ln2_g, ln2_b)                      # norm2(x + ff)
    h_ref[...] = hnew

    # --- final phase: mean over players (row-block sum) + fc ---
    @pl.when(layer == num_layers - 1)
    def _():
        pooled = hnew[0:B, :]
        for pp in range(1, P):
            pooled = pooled + hnew[pp * B:(pp + 1) * B, :]
        pooled = pooled * (1.0 / P)                               # (B, D)
        fc = fc_ref[...]                                          # (D+1, C)
        o_ref[...] = jnp.dot(pooled, fc[:D, :],
                             preferred_element_type=f32) + fc[D:, :]


# ------------------------------ forward wrapper ------------------------------

def coverage_classifier_forward(x, params, *, num_heads):
    B, P, F = x.shape
    D = params['emb_w'].shape[1]
    L = len(params['layers'])
    C = params['fc_w'].shape[1]
    M = B * P
    D4 = 4 * D
    scale = 1.0 / math.sqrt(D // num_heads)

    # Fold eval-mode BatchNorm into the embedding Linear (one-time prep).
    s = params['bn_g'] * lax.rsqrt(params['bn_v'] + EPS)          # (1, F)
    t = params['bn_b'] - params['bn_m'] * s                       # (1, F)
    emb_w = (params['emb_w'] * s.reshape(F, 1)).astype(jnp.bfloat16)   # (F, D) bf16
    emb_b = params['emb_b'] + t @ params['emb_w']                 # (1, D) f32
    emb_small = jnp.concatenate(
        [emb_b, params['emb_ln_g'], params['emb_ln_b']], axis=0)  # (3, D)

    def pad_to(v, w):
        return jnp.pad(v, ((0, 0), (0, w - v.shape[1])))

    def prep_layer(lp):
        # fold the 1/sqrt(dh) softmax scale into the Q columns of the in-projection
        w_qkv = jnp.concatenate([lp['w_qkv'][:, :D] * scale, lp['w_qkv'][:, D:]], axis=1)
        b_qkv = jnp.concatenate([lp['b_qkv'][:, :D] * scale, lp['b_qkv'][:, D:]], axis=1)
        small = jnp.concatenate([
            pad_to(b_qkv, D4), pad_to(lp['b_o'], D4),
            pad_to(lp['ln1_g'], D4), pad_to(lp['ln1_b'], D4),
            pad_to(lp['b_ff1'], D4), pad_to(lp['b_ff2'], D4),
            pad_to(lp['ln2_g'], D4), pad_to(lp['ln2_b'], D4)], axis=0)   # (8, 4D)
        return w_qkv, small

    prepped = [prep_layer(lp) for lp in params['layers']]
    wqkv_all = jnp.stack([w for w, _ in prepped]).astype(jnp.bfloat16)   # (L, D, 3D)
    small_all = jnp.stack([sl for _, sl in prepped])                     # (L, 8, 4D) f32
    wo_all = jnp.stack([lp['w_o'] for lp in params['layers']]).astype(jnp.bfloat16)
    wff1_all = jnp.stack([lp['w_ff1'] for lp in params['layers']]).astype(jnp.bfloat16)
    wff2_all = jnp.stack([lp['w_ff2'] for lp in params['layers']]).astype(jnp.bfloat16)
    fc_all = jnp.concatenate([params['fc_w'], params['fc_b']], axis=0)   # (D+1, C)

    # Player-major rows: batch_first=False attention becomes block-diagonal per player.
    x2d = jnp.transpose(x, (1, 0, 2)).reshape(M, F)

    kernel = functools.partial(fused_forward_kernel,
                               num_heads=num_heads, num_players=P)

    grid_spec = pltpu.PrefetchScalarGridSpec(
        num_scalar_prefetch=0,
        grid=(L,),
        in_specs=[
            pl.BlockSpec((M, F), lambda l: (0, 0)),               # x (resident)
            pl.BlockSpec((F, D), lambda l: (0, 0)),               # emb_w (resident)
            pl.BlockSpec((3, D), lambda l: (0, 0)),               # emb small params
            pl.BlockSpec((1, D, 3 * D), lambda l: (l, 0, 0)),     # wqkv  (streamed)
            pl.BlockSpec((1, D, D), lambda l: (l, 0, 0)),         # wo    (streamed)
            pl.BlockSpec((1, D, D4), lambda l: (l, 0, 0)),        # wff1  (streamed)
            pl.BlockSpec((1, D4, D), lambda l: (l, 0, 0)),        # wff2  (streamed)
            pl.BlockSpec((1, 8, D4), lambda l: (l, 0, 0)),        # small (streamed)
            pl.BlockSpec((D + 1, C), lambda l: (0, 0)),           # fc (resident)
        ],
        out_specs=pl.BlockSpec((B, C), lambda l: (0, 0)),
        scratch_shapes=[pltpu.VMEM((M, D), jnp.float32)],         # running activations
    )

    return pl.pallas_call(
        kernel,
        out_shape=jax.ShapeDtypeStruct((B, C), jnp.float32),
        grid_spec=grid_spec,
        compiler_params=pltpu.CompilerParams(
            dimension_semantics=("arbitrary",),                   # layers are sequential
            vmem_limit_bytes=48 * 1024 * 1024),                   # fits v7x's 64 MiB VMEM
    )(x2d, emb_w, emb_small, wqkv_all, wo_all, wff1_all, wff2_all, small_all, fc_all)


# ------------------------------ parameter init ------------------------------

def init_params(key, num_features, num_classes, num_layers, model_dim):
    ff = model_dim * 4
    keys = jax.random.split(key, 3 + num_layers)

    def linear_init(k, din, dout):
        bound = 1.0 / math.sqrt(din)
        kw, kb = jax.random.split(k)
        w = jax.random.uniform(kw, (din, dout), jnp.float32, -bound, bound)
        b = jax.random.uniform(kb, (1, dout), jnp.float32, -bound, bound)
        return w, b

    bn_keys = jax.random.split(keys[0], 4)
    bn_g = 1.0 + 0.1 * jax.random.normal(bn_keys[0], (1, num_features), jnp.float32)
    bn_b = 0.1 * jax.random.normal(bn_keys[1], (1, num_features), jnp.float32)
    bn_m = 0.1 * jax.random.normal(bn_keys[2], (1, num_features), jnp.float32)
    bn_v = 0.5 + jnp.abs(jax.random.normal(bn_keys[3], (1, num_features), jnp.float32))

    emb_w, emb_b = linear_init(keys[1], num_features, model_dim)

    layers = []
    for i in range(num_layers):
        lk = jax.random.split(keys[3 + i], 4)
        w_qkv, b_qkv = linear_init(lk[0], model_dim, 3 * model_dim)
        w_o, b_o = linear_init(lk[1], model_dim, model_dim)
        w_ff1, b_ff1 = linear_init(lk[2], model_dim, ff)
        w_ff2, b_ff2 = linear_init(lk[3], ff, model_dim)
        layers.append(dict(
            w_qkv=w_qkv, b_qkv=b_qkv, w_o=w_o, b_o=b_o,
            ln1_g=jnp.ones((1, model_dim), jnp.float32),
            ln1_b=jnp.zeros((1, model_dim), jnp.float32),
            w_ff1=w_ff1, b_ff1=b_ff1, w_ff2=w_ff2, b_ff2=b_ff2,
            ln2_g=jnp.ones((1, model_dim), jnp.float32),
            ln2_b=jnp.zeros((1, model_dim), jnp.float32),
        ))

    fc_w, fc_b = linear_init(keys[2], model_dim, num_classes)

    return dict(bn_g=bn_g, bn_b=bn_b, bn_m=bn_m, bn_v=bn_v,
                emb_w=emb_w, emb_b=emb_b,
                emb_ln_g=jnp.ones((1, model_dim), jnp.float32),
                emb_ln_b=jnp.zeros((1, model_dim), jnp.float32),
                layers=layers, fc_w=fc_w, fc_b=fc_b)


# ----------------------------------- main -----------------------------------

if __name__ == "__main__":
    # small config: num_players=8, num_features=16, num_classes=4,
    #               num_heads=2, num_layers=2, model_dim=32, batch=2
    B, P, F = 2, 8, 16
    num_classes, num_heads, num_layers, model_dim = 4, 2, 2, 32

    key = jax.random.PRNGKey(0)
    kx, kp = jax.random.split(key)
    x = jax.random.normal(kx, (B, P, F), jnp.float32)
    params = init_params(kp, F, num_classes, num_layers, model_dim)

    fwd = jax.jit(functools.partial(coverage_classifier_forward, num_heads=num_heads))
    logits = fwd(x, params)
    jax.block_until_ready(logits)
    assert logits.shape == (B, num_classes)
    assert bool(jnp.all(jnp.isfinite(logits)))
    print("KERNEL_OK")
</pallas_src>

<mosaic_0001>
module attributes {stable_mosaic.version = 11 : i64} {
  func.func @fused_forward_kernel(%arg0: i32, %arg1: memref<16x16xf32, #tpu.memory_space<vmem>>, %arg2: memref<16x32xbf16, #tpu.memory_space<vmem>>, %arg3: memref<3x32xf32, #tpu.memory_space<vmem>>, %arg4: memref<1x32x96xbf16, #tpu.memory_space<vmem>>, %arg5: memref<1x32x32xbf16, #tpu.memory_space<vmem>>, %arg6: memref<1x32x128xbf16, #tpu.memory_space<vmem>>, %arg7: memref<1x128x32xbf16, #tpu.memory_space<vmem>>, %arg8: memref<1x8x128xf32, #tpu.memory_space<vmem>>, %arg9: memref<33x4xf32, #tpu.memory_space<vmem>>, %arg10: memref<2x4xf32, #tpu.memory_space<vmem>>, %arg11: memref<16x32xf32, #tpu.memory_space<vmem>>) attributes {dimension_semantics = [#tpu.dimension_semantics<arbitrary>], iteration_bounds = array<i64: 2>, scalar_prefetch = 0 : i64, scratch_operands = 1 : i64, tpu.core_type = #tpu.core_type<tc>, window_params = [{pipeline_mode = #tpu.pipeline_mode<synchronous>, transform_indices = @transform_0, window_bounds = array<i64: 16, 16>}, {pipeline_mode = #tpu.pipeline_mode<synchronous>, transform_indices = @transform_1, window_bounds = array<i64: 16, 32>}, {pipeline_mode = #tpu.pipeline_mode<synchronous>, transform_indices = @transform_2, window_bounds = array<i64: 3, 32>}, {transform_indices = @transform_3, window_bounds = array<i64: 1, 32, 96>}, {transform_indices = @transform_4, window_bounds = array<i64: 1, 32, 32>}, {transform_indices = @transform_5, window_bounds = array<i64: 1, 32, 128>}, {transform_indices = @transform_6, window_bounds = array<i64: 1, 128, 32>}, {transform_indices = @transform_7, window_bounds = array<i64: 1, 8, 128>}, {pipeline_mode = #tpu.pipeline_mode<synchronous>, transform_indices = @transform_8, window_bounds = array<i64: 33, 4>}, {pipeline_mode = #tpu.pipeline_mode<synchronous>, transform_indices = @transform_9, window_bounds = array<i64: 2, 4>}]} {
    %c0_i32 = arith.constant 0 : i32
    %0 = arith.cmpi eq, %arg0, %c0_i32 : i32
    %1 = arith.extui %0 : i1 to i32
    %c0_i32_0 = arith.constant 0 : i32
    %2 = arith.cmpi ne, %1, %c0_i32_0 : i32
    scf.if %2 {
      %c0_98 = arith.constant 0 : index
      %c0_99 = arith.constant 0 : index
      %371 = vector.load %arg3[%c0_98, %c0_99] : memref<3x32xf32, #tpu.memory_space<vmem>>, vector<3x32xf32>
      %c0_100 = arith.constant 0 : index
      %c0_101 = arith.constant 0 : index
      %372 = vector.load %arg1[%c0_100, %c0_101] : memref<16x16xf32, #tpu.memory_space<vmem>>, vector<16x16xf32>
      %373 = arith.truncf %372 : vector<16x16xf32> to vector<16x16xbf16>
      %c0_102 = arith.constant 0 : index
      %c0_103 = arith.constant 0 : index
      %374 = vector.load %arg2[%c0_102, %c0_103] : memref<16x32xbf16, #tpu.memory_space<vmem>>, vector<16x32xbf16>
      %cst_104 = arith.constant dense<0.000000e+00> : vector<16x32xf32>
      %375 = tpu.matmul %373, %374, %cst_104 {dimension_numbers = #tpu.dot_dimension_numbers<[1], [0], [0], [1], [0, 0, 1, 1], [], []>} : vector<16x16xbf16>, vector<16x32xbf16>, vector<16x32xf32> -> vector<16x32xf32>
      %376 = vector.extract_strided_slice %371 {offsets = [0, 0], sizes = [1, 32], strides = [1, 1]} : vector<3x32xf32> to vector<1x32xf32>
      %377 = vector.broadcast %376 : vector<1x32xf32> to vector<16x32xf32>
      %378 = arith.addf %375, %377 : vector<16x32xf32>
      %cst_105 = arith.constant 0.000000e+00 : f32
      %379 = vector.broadcast %cst_105 : f32 to vector<16x32xf32>
      %380 = arith.maximumf %378, %379 : vector<16x32xf32>
      %381 = vector.extract_strided_slice %371 {offsets = [1, 0], sizes = [1, 32], strides = [1, 1]} : vector<3x32xf32> to vector<1x32xf32>
      %382 = vector.extract_strided_slice %371 {offsets = [2, 0], sizes = [1, 32], strides = [1, 1]} : vector<3x32xf32> to vector<1x32xf32>
      %cst_106 = arith.constant dense<0.000000e+00> : vector<16xf32>
      %383 = vector.multi_reduction <add>, %380, %cst_106 [1] : vector<16x32xf32> to vector<16xf32>
      %384 = vector.shape_cast %383 : vector<16xf32> to vector<16x1xf32>
      %cst_107 = arith.constant 3.200000e+01 : f32
      %385 = vector.broadcast %cst_107 : f32 to vector<16x1xf32>
      %386 = arith.divf %384, %385 : vector<16x1xf32>
      %387 = vector.broadcast %386 : vector<16x1xf32> to vector<16x32xf32>
      %388 = arith.subf %380, %387 : vector<16x32xf32>
      %389 = arith.mulf %388, %388 : vector<16x32xf32>
      %cst_108 = arith.constant dense<0.000000e+00> : vector<16xf32>
      %390 = vector.multi_reduction <add>, %389, %cst_108 [1] : vector<16x32xf32> to vector<16xf32>
      %391 = vector.shape_cast %390 : vector<16xf32> to vector<16x1xf32>
      %cst_109 = arith.constant 3.200000e+01 : f32
      %392 = vector.broadcast %cst_109 : f32 to vector<16x1xf32>
      %393 = arith.divf %391, %392 : vector<16x1xf32>
      %394 = vector.broadcast %386 : vector<16x1xf32> to vector<16x32xf32>
      %395 = arith.subf %380, %394 : vector<16x32xf32>
      %cst_110 = arith.constant 9.99999974E-6 : f32
      %396 = vector.broadcast %cst_110 : f32 to vector<16x1xf32>
      %397 = arith.addf %393, %396 : vector<16x1xf32>
      %398 = math.rsqrt %397 : vector<16x1xf32>
      %399 = vector.broadcast %398 : vector<16x1xf32> to vector<16x32xf32>
      %400 = arith.mulf %395, %399 : vector<16x32xf32>
      %401 = vector.broadcast %381 : vector<1x32xf32> to vector<16x32xf32>
      %402 = arith.mulf %400, %401 : vector<16x32xf32>
      %403 = vector.broadcast %382 : vector<1x32xf32> to vector<16x32xf32>
      %404 = arith.addf %402, %403 : vector<16x32xf32>
      %c0_111 = arith.constant 0 : index
      %c0_112 = arith.constant 0 : index
      %405 = vector.load %arg11[%c0_111, %c0_112] : memref<16x32xf32, #tpu.memory_space<vmem>>, vector<16x32xf32>
      tpu.vector_store %arg11[%c0_111, %c0_112], %404 {strides = array<i32>} : memref<16x32xf32, #tpu.memory_space<vmem>>, vector<16x32xf32>,
    } else {
    }
    %c0 = arith.constant 0 : index
    %c0_1 = arith.constant 0 : index
    %c0_2 = arith.constant 0 : index
    %3 = vector.load %arg8[%c0, %c0_1, %c0_2] : memref<1x8x128xf32, #tpu.memory_space<vmem>>, vector<1x8x128xf32>
    %4 = vector.shape_cast %3 : vector<1x8x128xf32> to vector<8x128xf32>
    %5 = vector.extract_strided_slice %4 {offsets = [0, 0], sizes = [1, 96], strides = [1, 1]} : vector<8x128xf32> to vector<1x96xf32>
    %6 = vector.extract_strided_slice %4 {offsets = [1, 0], sizes = [1, 32], strides = [1, 1]} : vector<8x128xf32> to vector<1x32xf32>
    %7 = vector.extract_strided_slice %4 {offsets = [2, 0], sizes = [1, 32], strides = [1, 1]} : vector<8x128xf32> to vector<1x32xf32>
    %8 = vector.extract_strided_slice %4 {offsets = [3, 0], sizes = [1, 32], strides = [1, 1]} : vector<8x128xf32> to vector<1x32xf32>
    %9 = vector.extract_strided_slice %4 {offsets = [4, 0], sizes = [1, 128], strides = [1, 1]} : vector<8x128xf32> to vector<1x128xf32>
    %10 = vector.extract_strided_slice %4 {offsets = [5, 0], sizes = [1, 32], strides = [1, 1]} : vector<8x128xf32> to vector<1x32xf32>
    %11 = vector.extract_strided_slice %4 {offsets = [6, 0], sizes = [1, 32], strides = [1, 1]} : vector<8x128xf32> to vector<1x32xf32>
    %12 = vector.extract_strided_slice %4 {offsets = [7, 0], sizes = [1, 32], strides = [1, 1]} : vector<8x128xf32> to vector<1x32xf32>
    %c0_3 = arith.constant 0 : index
    %c0_4 = arith.constant 0 : index
    %13 = vector.load %arg11[%c0_3, %c0_4] : memref<16x32xf32, #tpu.memory_space<vmem>>, vector<16x32xf32>
    %14 = arith.truncf %13 : vector<16x32xf32> to vector<16x32xbf16>
    %c0_5 = arith.constant 0 : index
    %c0_6 = arith.constant 0 : index
    %c0_7 = arith.constant 0 : index
    %15 = vector.load %arg4[%c0_5, %c0_6, %c0_7] : memref<1x32x96xbf16, #tpu.memory_space<vmem>>, vector<1x32x96xbf16>
    %16 = vector.shape_cast %15 : vector<1x32x96xbf16> to vector<32x96xbf16>
    %cst = arith.constant dense<0.000000e+00> : vector<16x96xf32>
    %17 = tpu.matmul %14, %16, %cst {dimension_numbers = #tpu.dot_dimension_numbers<[1], [0], [0], [1], [0, 0, 1, 1], [], []>} : vector<16x32xbf16>, vector<32x96xbf16>, vector<16x96xf32> -> vector<16x96xf32>
    %18 = vector.broadcast %5 : vector<1x96xf32> to vector<16x96xf32>
    %19 = arith.addf %17, %18 : vector<16x96xf32>
    %20 = vector.extract_strided_slice %19 {offsets = [0, 0], sizes = [2, 16], strides = [1, 1]} : vector<16x96xf32> to vector<2x16xf32>
    %21 = vector.extract_strided_slice %19 {offsets = [0, 32], sizes = [2, 16], strides = [1, 1]} : vector<16x96xf32> to vector<2x16xf32>
    %22 = vector.extract_strided_slice %19 {offsets = [0, 64], sizes = [2, 16], strides = [1, 1]} : vector<16x96xf32> to vector<2x16xf32>
    %cst_8 = arith.constant dense<0.000000e+00> : vector<2x2xf32>
    %23 = tpu.matmul %20, %21, %cst_8 {dimension_numbers = #tpu.dot_dimension_numbers<[1], [1], [0], [0], [0, 0, 1, 0], [], []>} : vector<2x16xf32>, vector<2x16xf32>, vector<2x2xf32> -> vector<2x2xf32>
    %cst_9 = arith.constant dense<0xFF800000> : vector<2xf32>
    %24 = vector.multi_reduction <maximumf>, %23, %cst_9 [1] : vector<2x2xf32> to vector<2xf32>
    %25 = vector.shape_cast %24 : vector<2xf32> to vector<2x1xf32>
    %26 = vector.broadcast %25 : vector<2x1xf32> to vector<2x2xf32>
    %27 = arith.subf %23, %26 : vector<2x2xf32>
    %28 = math.exp %27 : vector<2x2xf32>
    %cst_10 = arith.constant dense<0.000000e+00> : vector<2xf32>
    %29 = vector.multi_reduction <add>, %28, %cst_10 [1] : vector<2x2xf32> to vector<2xf32>
    %30 = vector.shape_cast %29 : vector<2xf32> to vector<2x1xf32>
    %31 = tpu.reciprocal %30 {approx = true} : vector<2x1xf32> -> vector<2x1xf32>
    %32 = vector.broadcast %31 : vector<2x1xf32> to vector<2x2xf32>
    %33 = arith.mulf %28, %32 : vector<2x2xf32>
    %34 = arith.truncf %33 : vector<2x2xf32> to vector<2x2xbf16>
    %35 = arith.truncf %22 : vector<2x16xf32> to vector<2x16xbf16>
    %cst_11 = arith.constant dense<0.000000e+00> : vector<2x16xf32>
    %36 = tpu.matmul %34, %35, %cst_11 {dimension_numbers = #tpu.dot_dimension_numbers<[1], [0], [0], [1], [0, 0, 1, 1], [], []>} : vector<2x2xbf16>, vector<2x16xbf16>, vector<2x16xf32> -> vector<2x16xf32>
    %37 = vector.extract_strided_slice %19 {offsets = [0, 16], sizes = [2, 16], strides = [1, 1]} : vector<16x96xf32> to vector<2x16xf32>
    %38 = vector.extract_strided_slice %19 {offsets = [0, 48], sizes = [2, 16], strides = [1, 1]} : vector<16x96xf32> to vector<2x16xf32>
    %39 = vector.extract_strided_slice %19 {offsets = [0, 80], sizes = [2, 16], strides = [1, 1]} : vector<16x96xf32> to vector<2x16xf32>
    %cst_12 = arith.constant dense<0.000000e+00> : vector<2x2xf32>
    %40 = tpu.matmul %37, %38, %cst_12 {dimension_numbers = #tpu.dot_dimension_numbers<[1], [1], [0], [0], [0, 0, 1, 0], [], []>} : vector<2x16xf32>, vector<2x16xf32>, vector<2x2xf32> -> vector<2x2xf32>
    %cst_13 = arith.constant dense<0xFF800000> : vector<2xf32>
    %41 = vector.multi_reduction <maximumf>, %40, %cst_13 [1] : vector<2x2xf32> to vector<2xf32>
    %42 = vector.shape_cast %41 : vector<2xf32> to vector<2x1xf32>
    %43 = vector.broadcast %42 : vector<2x1xf32> to vector<2x2xf32>
    %44 = arith.subf %40, %43 : vector<2x2xf32>
    %45 = math.exp %44 : vector<2x2xf32>
    %cst_14 = arith.constant dense<0.000000e+00> : vector<2xf32>
    %46 = vector.multi_reduction <add>, %45, %cst_14 [1] : vector<2x2xf32> to vector<2xf32>
    %47 = vector.shape_cast %46 : vector<2xf32> to vector<2x1xf32>
    %48 = tpu.reciprocal %47 {approx = true} : vector<2x1xf32> -> vector<2x1xf32>
    %49 = vector.broadcast %48 : vector<2x1xf32> to vector<2x2xf32>
    %50 = arith.mulf %45, %49 : vector<2x2xf32>
    %51 = arith.truncf %50 : vector<2x2xf32> to vector<2x2xbf16>
    %52 = arith.truncf %39 : vector<2x16xf32> to vector<2x16xbf16>
    %cst_15 = arith.constant dense<0.000000e+00> : vector<2x16xf32>
    %53 = tpu.matmul %51, %52, %cst_15 {dimension_numbers = #tpu.dot_dimension_numbers<[1], [0], [0], [1], [0, 0, 1, 1], [], []>} : vector<2x2xbf16>, vector<2x16xbf16>, vector<2x16xf32> -> vector<2x16xf32>
    %54 = tpu.concatenate %36, %53 in 1 : vector<2x16xf32>, vector<2x16xf32> -> vector<2x32xf32>
    %55 = vector.extract_strided_slice %19 {offsets = [2, 0], sizes = [2, 16], strides = [1, 1]} : vector<16x96xf32> to vector<2x16xf32>
    %56 = vector.extract_strided_slice %19 {offsets = [2, 32], sizes = [2, 16], strides = [1, 1]} : vector<16x96xf32> to vector<2x16xf32>
    %57 = vector.extract_strided_slice %19 {offsets = [2, 64], sizes = [2, 16], strides = [1, 1]} : vector<16x96xf32> to vector<2x16xf32>
    %cst_16 = arith.constant dense<0.000000e+00> : vector<2x2xf32>
    %58 = tpu.matmul %55, %56, %cst_16 {dimension_numbers = #tpu.dot_dimension_numbers<[1], [1], [0], [0], [0, 0, 1, 0], [], []>} : vector<2x16xf32>, vector<2x16xf32>, vector<2x2xf32> -> vector<2x2xf32>
    %cst_17 = arith.constant dense<0xFF800000> : vector<2xf32>
    %59 = vector.multi_reduction <maximumf>, %58, %cst_17 [1] : vector<2x2xf32> to vector<2xf32>
    %60 = vector.shape_cast %59 : vector<2xf32> to vector<2x1xf32>
    %61 = vector.broadcast %60 : vector<2x1xf32> to vector<2x2xf32>
    %62 = arith.subf %58, %61 : vector<2x2xf32>
    %63 = math.exp %62 : vector<2x2xf32>
    %cst_18 = arith.constant dense<0.000000e+00> : vector<2xf32>
    %64 = vector.multi_reduction <add>, %63, %cst_18 [1] : vector<2x2xf32> to vector<2xf32>
    %65 = vector.shape_cast %64 : vector<2xf32> to vector<2x1xf32>
    %66 = tpu.reciprocal %65 {approx = true} : vector<2x1xf32> -> vector<2x1xf32>
    %67 = vector.broadcast %66 : vector<2x1xf32> to vector<2x2xf32>
    %68 = arith.mulf %63, %67 : vector<2x2xf32>
    %69 = arith.truncf %68 : vector<2x2xf32> to vector<2x2xbf16>
    %70 = arith.truncf %57 : vector<2x16xf32> to vector<2x16xbf16>
    %cst_19 = arith.constant dense<0.000000e+00> : vector<2x16xf32>
    %71 = tpu.matmul %69, %70, %cst_19 {dimension_numbers = #tpu.dot_dimension_numbers<[1], [0], [0], [1], [0, 0, 1, 1], [], []>} : vector<2x2xbf16>, vector<2x16xbf16>, vector<2x16xf32> -> vector<2x16xf32>
    %72 = vector.extract_strided_slice %19 {offsets = [2, 16], sizes = [2, 16], strides = [1, 1]} : vector<16x96xf32> to vector<2x16xf32>
    %73 = vector.extract_strided_slice %19 {offsets = [2, 48], sizes = [2, 16], strides = [1, 1]} : vector<16x96xf32> to vector<2x16xf32>
    %74 = vector.extract_strided_slice %19 {offsets = [2, 80], sizes = [2, 16], strides = [1, 1]} : vector<16x96xf32> to vector<2x16xf32>
    %cst_20 = arith.constant dense<0.000000e+00> : vector<2x2xf32>
    %75 = tpu.matmul %72, %73, %cst_20 {dimension_numbers = #tpu.dot_dimension_numbers<[1], [1], [0], [0], [0, 0, 1, 0], [], []>} : vector<2x16xf32>, vector<2x16xf32>, vector<2x2xf32> -> vector<2x2xf32>
    %cst_21 = arith.constant dense<0xFF800000> : vector<2xf32>
    %76 = vector.multi_reduction <maximumf>, %75, %cst_21 [1] : vector<2x2xf32> to vector<2xf32>
    %77 = vector.shape_cast %76 : vector<2xf32> to vector<2x1xf32>
    %78 = vector.broadcast %77 : vector<2x1xf32> to vector<2x2xf32>
    %79 = arith.subf %75, %78 : vector<2x2xf32>
    %80 = math.exp %79 : vector<2x2xf32>
    %cst_22 = arith.constant dense<0.000000e+00> : vector<2xf32>
    %81 = vector.multi_reduction <add>, %80, %cst_22 [1] : vector<2x2xf32> to vector<2xf32>
    %82 = vector.shape_cast %81 : vector<2xf32> to vector<2x1xf32>
    %83 = tpu.reciprocal %82 {approx = true} : vector<2x1xf32> -> vector<2x1xf32>
    %84 = vector.broadcast %83 : vector<2x1xf32> to vector<2x2xf32>
    %85 = arith.mulf %80, %84 : vector<2x2xf32>
    %86 = arith.truncf %85 : vector<2x2xf32> to vector<2x2xbf16>
    %87 = arith.truncf %74 : vector<2x16xf32> to vector<2x16xbf16>
    %cst_23 = arith.constant dense<0.000000e+00> : vector<2x16xf32>
    %88 = tpu.matmul %86, %87, %cst_23 {dimension_numbers = #tpu.dot_dimension_numbers<[1], [0], [0], [1], [0, 0, 1, 1], [], []>} : vector<2x2xbf16>, vector<2x16xbf16>, vector<2x16xf32> -> vector<2x16xf32>
    %89 = tpu.concatenate %71, %88 in 1 : vector<2x16xf32>, vector<2x16xf32> -> vector<2x32xf32>
    %90 = vector.extract_strided_slice %19 {offsets = [4, 0], sizes = [2, 16], strides = [1, 1]} : vector<16x96xf32> to vector<2x16xf32>
    %91 = vector.extract_strided_slice %19 {offsets = [4, 32], sizes = [2, 16], strides = [1, 1]} : vector<16x96xf32> to vector<2x16xf32>
    %92 = vector.extract_strided_slice %19 {offsets = [4, 64], sizes = [2, 16], strides = [1, 1]} : vector<16x96xf32> to vector<2x16xf32>
    %cst_24 = arith.constant dense<0.000000e+00> : vector<2x2xf32>
    %93 = tpu.matmul %90, %91, %cst_24 {dimension_numbers = #tpu.dot_dimension_numbers<[1], [1], [0], [0], [0, 0, 1, 0], [], []>} : vector<2x16xf32>, vector<2x16xf32>, vector<2x2xf32> -> vector<2x2xf32>
    %cst_25 = arith.constant dense<0xFF800000> : vector<2xf32>
    %94 = vector.multi_reduction <maximumf>, %93, %cst_25 [1] : vector<2x2xf32> to vector<2xf32>
    %95 = vector.shape_cast %94 : vector<2xf32> to vector<2x1xf32>
    %96 = vector.broadcast %95 : vector<2x1xf32> to vector<2x2xf32>
    %97 = arith.subf %93, %96 : vector<2x2xf32>
    %98 = math.exp %97 : vector<2x2xf32>
    %cst_26 = arith.constant dense<0.000000e+00> : vector<2xf32>
    %99 = vector.multi_reduction <add>, %98, %cst_26 [1] : vector<2x2xf32> to vector<2xf32>
    %100 = vector.shape_cast %99 : vector<2xf32> to vector<2x1xf32>
    %101 = tpu.reciprocal %100 {approx = true} : vector<2x1xf32> -> vector<2x1xf32>
    %102 = vector.broadcast %101 : vector<2x1xf32> to vector<2x2xf32>
    %103 = arith.mulf %98, %102 : vector<2x2xf32>
    %104 = arith.truncf %103 : vector<2x2xf32> to vector<2x2xbf16>
    %105 = arith.truncf %92 : vector<2x16xf32> to vector<2x16xbf16>
    %cst_27 = arith.constant dense<0.000000e+00> : vector<2x16xf32>
    %106 = tpu.matmul %104, %105, %cst_27 {dimension_numbers = #tpu.dot_dimension_numbers<[1], [0], [0], [1], [0, 0, 1, 1], [], []>} : vector<2x2xbf16>, vector<2x16xbf16>, vector<2x16xf32> -> vector<2x16xf32>
    %107 = vector.extract_strided_slice %19 {offsets = [4, 16], sizes = [2, 16], strides = [1, 1]} : vector<16x96xf32> to vector<2x16xf32>
    %108 = vector.extract_strided_slice %19 {offsets = [4, 48], sizes = [2, 16], strides = [1, 1]} : vector<16x96xf32> to vector<2x16xf32>
    %109 = vector.extract_strided_slice %19 {offsets = [4, 80], sizes = [2, 16], strides = [1, 1]} : vector<16x96xf32> to vector<2x16xf32>
    %cst_28 = arith.constant dense<0.000000e+00> : vector<2x2xf32>
    %110 = tpu.matmul %107, %108, %cst_28 {dimension_numbers = #tpu.dot_dimension_numbers<[1], [1], [0], [0], [0, 0, 1, 0], [], []>} : vector<2x16xf32>, vector<2x16xf32>, vector<2x2xf32> -> vector<2x2xf32>
    %cst_29 = arith.constant dense<0xFF800000> : vector<2xf32>
    %111 = vector.multi_reduction <maximumf>, %110, %cst_29 [1] : vector<2x2xf32> to vector<2xf32>
    %112 = vector.shape_cast %111 : vector<2xf32> to vector<2x1xf32>
    %113 = vector.broadcast %112 : vector<2x1xf32> to vector<2x2xf32>
    %114 = arith.subf %110, %113 : vector<2x2xf32>
    %115 = math.exp %114 : vector<2x2xf32>
    %cst_30 = arith.constant dense<0.000000e+00> : vector<2xf32>
    %116 = vector.multi_reduction <add>, %115, %cst_30 [1] : vector<2x2xf32> to vector<2xf32>
    %117 = vector.shape_cast %116 : vector<2xf32> to vector<2x1xf32>
    %118 = tpu.reciprocal %117 {approx = true} : vector<2x1xf32> -> vector<2x1xf32>
    %119 = vector.broadcast %118 : vector<2x1xf32> to vector<2x2xf32>
    %120 = arith.mulf %115, %119 : vector<2x2xf32>
    %121 = arith.truncf %120 : vector<2x2xf32> to vector<2x2xbf16>
    %122 = arith.truncf %109 : vector<2x16xf32> to vector<2x16xbf16>
    %cst_31 = arith.constant dense<0.000000e+00> : vector<2x16xf32>
    %123 = tpu.matmul %121, %122, %cst_31 {dimension_numbers = #tpu.dot_dimension_numbers<[1], [0], [0], [1], [0, 0, 1, 1], [], []>} : vector<2x2xbf16>, vector<2x16xbf16>, vector<2x16xf32> -> vector<2x16xf32>
    %124 = tpu.concatenate %106, %123 in 1 : vector<2x16xf32>, vector<2x16xf32> -> vector<2x32xf32>
    %125 = vector.extract_strided_slice %19 {offsets = [6, 0], sizes = [2, 16], strides = [1, 1]} : vector<16x96xf32> to vector<2x16xf32>
    %126 = vector.extract_strided_slice %19 {offsets = [6, 32], sizes = [2, 16], strides = [1, 1]} : vector<16x96xf32> to vector<2x16xf32>
    %127 = vector.extract_strided_slice %19 {offsets = [6, 64], sizes = [2, 16], strides = [1, 1]} : vector<16x96xf32> to vector<2x16xf32>
    %cst_32 = arith.constant dense<0.000000e+00> : vector<2x2xf32>
    %128 = tpu.matmul %125, %126, %cst_32 {dimension_numbers = #tpu.dot_dimension_numbers<[1], [1], [0], [0], [0, 0, 1, 0], [], []>} : vector<2x16xf32>, vector<2x16xf32>, vector<2x2xf32> -> vector<2x2xf32>
    %cst_33 = arith.constant dense<0xFF800000> : vector<2xf32>
    %129 = vector.multi_reduction <maximumf>, %128, %cst_33 [1] : vector<2x2xf32> to vector<2xf32>
    %130 = vector.shape_cast %129 : vector<2xf32> to vector<2x1xf32>
    %131 = vector.broadcast %130 : vector<2x1xf32> to vector<2x2xf32>
    %132 = arith.subf %128, %131 : vector<2x2xf32>
    %133 = math.exp %132 : vector<2x2xf32>
    %cst_34 = arith.constant dense<0.000000e+00> : vector<2xf32>
    %134 = vector.multi_reduction <add>, %133, %cst_34 [1] : vector<2x2xf32> to vector<2xf32>
    %135 = vector.shape_cast %134 : vector<2xf32> to vector<2x1xf32>
    %136 = tpu.reciprocal %135 {approx = true} : vector<2x1xf32> -> vector<2x1xf32>
    %137 = vector.broadcast %136 : vector<2x1xf32> to vector<2x2xf32>
    %138 = arith.mulf %133, %137 : vector<2x2xf32>
    %139 = arith.truncf %138 : vector<2x2xf32> to vector<2x2xbf16>
    %140 = arith.truncf %127 : vector<2x16xf32> to vector<2x16xbf16>
    %cst_35 = arith.constant dense<0.000000e+00> : vector<2x16xf32>
    %141 = tpu.matmul %139, %140, %cst_35 {dimension_numbers = #tpu.dot_dimension_numbers<[1], [0], [0], [1], [0, 0, 1, 1], [], []>} : vector<2x2xbf16>, vector<2x16xbf16>, vector<2x16xf32> -> vector<2x16xf32>
    %142 = vector.extract_strided_slice %19 {offsets = [6, 16], sizes = [2, 16], strides = [1, 1]} : vector<16x96xf32> to vector<2x16xf32>
    %143 = vector.extract_strided_slice %19 {offsets = [6, 48], sizes = [2, 16], strides = [1, 1]} : vector<16x96xf32> to vector<2x16xf32>
    %144 = vector.extract_strided_slice %19 {offsets = [6, 80], sizes = [2, 16], strides = [1, 1]} : vector<16x96xf32> to vector<2x16xf32>
    %cst_36 = arith.constant dense<0.000000e+00> : vector<2x2xf32>
    %145 = tpu.matmul %142, %143, %cst_36 {dimension_numbers = #tpu.dot_dimension_numbers<[1], [1], [0], [0], [0, 0, 1, 0], [], []>} : vector<2x16xf32>, vector<2x16xf32>, vector<2x2xf32> -> vector<2x2xf32>
    %cst_37 = arith.constant dense<0xFF800000> : vector<2xf32>
    %146 = vector.multi_reduction <maximumf>, %145, %cst_37 [1] : vector<2x2xf32> to vector<2xf32>
    %147 = vector.shape_cast %146 : vector<2xf32> to vector<2x1xf32>
    %148 = vector.broadcast %147 : vector<2x1xf32> to vector<2x2xf32>
    %149 = arith.subf %145, %148 : vector<2x2xf32>
    %150 = math.exp %149 : vector<2x2xf32>
    %cst_38 = arith.constant dense<0.000000e+00> : vector<2xf32>
    %151 = vector.multi_reduction <add>, %150, %cst_38 [1] : vector<2x2xf32> to vector<2xf32>
    %152 = vector.shape_cast %151 : vector<2xf32> to vector<2x1xf32>
    %153 = tpu.reciprocal %152 {approx = true} : vector<2x1xf32> -> vector<2x1xf32>
    %154 = vector.broadcast %153 : vector<2x1xf32> to vector<2x2xf32>
    %155 = arith.mulf %150, %154 : vector<2x2xf32>
    %156 = arith.truncf %155 : vector<2x2xf32> to vector<2x2xbf16>
    %157 = arith.truncf %144 : vector<2x16xf32> to vector<2x16xbf16>
    %cst_39 = arith.constant dense<0.000000e+00> : vector<2x16xf32>
    %158 = tpu.matmul %156, %157, %cst_39 {dimension_numbers = #tpu.dot_dimension_numbers<[1], [0], [0], [1], [0, 0, 1, 1], [], []>} : vector<2x2xbf16>, vector<2x16xbf16>, vector<2x16xf32> -> vector<2x16xf32>
    %159 = tpu.concatenate %141, %158 in 1 : vector<2x16xf32>, vector<2x16xf32> -> vector<2x32xf32>
    %160 = vector.extract_strided_slice %19 {offsets = [8, 0], sizes = [2, 16], strides = [1, 1]} : vector<16x96xf32> to vector<2x16xf32>
    %161 = vector.extract_strided_slice %19 {offsets = [8, 32], sizes = [2, 16], strides = [1, 1]} : vector<16x96xf32> to vector<2x16xf32>
    %162 = vector.extract_strided_slice %19 {offsets = [8, 64], sizes = [2, 16], strides = [1, 1]} : vector<16x96xf32> to vector<2x16xf32>
    %cst_40 = arith.constant dense<0.000000e+00> : vector<2x2xf32>
    %163 = tpu.matmul %160, %161, %cst_40 {dimension_numbers = #tpu.dot_dimension_numbers<[1], [1], [0], [0], [0, 0, 1, 0], [], []>} : vector<2x16xf32>, vector<2x16xf32>, vector<2x2xf32> -> vector<2x2xf32>
    %cst_41 = arith.constant dense<0xFF800000> : vector<2xf32>
    %164 = vector.multi_reduction <maximumf>, %163, %cst_41 [1] : vector<2x2xf32> to vector<2xf32>
    %165 = vector.shape_cast %164 : vector<2xf32> to vector<2x1xf32>
    %166 = vector.broadcast %165 : vector<2x1xf32> to vector<2x2xf32>
    %167 = arith.subf %163, %166 : vector<2x2xf32>
    %168 = math.exp %167 : vector<2x2xf32>
    %cst_42 = arith.constant dense<0.000000e+00> : vector<2xf32>
    %169 = vector.multi_reduction <add>, %168, %cst_42 [1] : vector<2x2xf32> to vector<2xf32>
    %170 = vector.shape_cast %169 : vector<2xf32> to vector<2x1xf32>
    %171 = tpu.reciprocal %170 {approx = true} : vector<2x1xf32> -> vector<2x1xf32>
    %172 = vector.broadcast %171 : vector<2x1xf32> to vector<2x2xf32>
    %173 = arith.mulf %168, %172 : vector<2x2xf32>
    %174 = arith.truncf %173 : vector<2x2xf32> to vector<2x2xbf16>
    %175 = arith.truncf %162 : vector<2x16xf32> to vector<2x16xbf16>
    %cst_43 = arith.constant dense<0.000000e+00> : vector<2x16xf32>
    %176 = tpu.matmul %174, %175, %cst_43 {dimension_numbers = #tpu.dot_dimension_numbers<[1], [0], [0], [1], [0, 0, 1, 1], [], []>} : vector<2x2xbf16>, vector<2x16xbf16>, vector<2x16xf32> -> vector<2x16xf32>
    %177 = vector.extract_strided_slice %19 {offsets = [8, 16], sizes = [2, 16], strides = [1, 1]} : vector<16x96xf32> to vector<2x16xf32>
    %178 = vector.extract_strided_slice %19 {offsets = [8, 48], sizes = [2, 16], strides = [1, 1]} : vector<16x96xf32> to vector<2x16xf32>
    %179 = vector.extract_strided_slice %19 {offsets = [8, 80], sizes = [2, 16], strides = [1, 1]} : vector<16x96xf32> to vector<2x16xf32>
    %cst_44 = arith.constant dense<0.000000e+00> : vector<2x2xf32>
    %180 = tpu.matmul %177, %178, %cst_44 {dimension_numbers = #tpu.dot_dimension_numbers<[1], [1], [0], [0], [0, 0, 1, 0], [], []>} : vector<2x16xf32>, vector<2x16xf32>, vector<2x2xf32> -> vector<2x2xf32>
    %cst_45 = arith.constant dense<0xFF800000> : vector<2xf32>
    %181 = vector.multi_reduction <maximumf>, %180, %cst_45 [1] : vector<2x2xf32> to vector<2xf32>
    %182 = vector.shape_cast %181 : vector<2xf32> to vector<2x1xf32>
    %183 = vector.broadcast %182 : vector<2x1xf32> to vector<2x2xf32>
    %184 = arith.subf %180, %183 : vector<2x2xf32>
    %185 = math.exp %184 : vector<2x2xf32>
    %cst_46 = arith.constant dense<0.000000e+00> : vector<2xf32>
    %186 = vector.multi_reduction <add>, %185, %cst_46 [1] : vector<2x2xf32> to vector<2xf32>
    %187 = vector.shape_cast %186 : vector<2xf32> to vector<2x1xf32>
    %188 = tpu.reciprocal %187 {approx = true} : vector<2x1xf32> -> vector<2x1xf32>
    %189 = vector.broadcast %188 : vector<2x1xf32> to vector<2x2xf32>
    %190 = arith.mulf %185, %189 : vector<2x2xf32>
    %191 = arith.truncf %190 : vector<2x2xf32> to vector<2x2xbf16>
    %192 = arith.truncf %179 : vector<2x16xf32> to vector<2x16xbf16>
    %cst_47 = arith.constant dense<0.000000e+00> : vector<2x16xf32>
    %193 = tpu.matmul %191, %192, %cst_47 {dimension_numbers = #tpu.dot_dimension_numbers<[1], [0], [0], [1], [0, 0, 1, 1], [], []>} : vector<2x2xbf16>, vector<2x16xbf16>, vector<2x16xf32> -> vector<2x16xf32>
    %194 = tpu.concatenate %176, %193 in 1 : vector<2x16xf32>, vector<2x16xf32> -> vector<2x32xf32>
    %195 = vector.extract_strided_slice %19 {offsets = [10, 0], sizes = [2, 16], strides = [1, 1]} : vector<16x96xf32> to vector<2x16xf32>
    %196 = vector.extract_strided_slice %19 {offsets = [10, 32], sizes = [2, 16], strides = [1, 1]} : vector<16x96xf32> to vector<2x16xf32>
    %197 = vector.extract_strided_slice %19 {offsets = [10, 64], sizes = [2, 16], strides = [1, 1]} : vector<16x96xf32> to vector<2x16xf32>
    %cst_48 = arith.constant dense<0.000000e+00> : vector<2x2xf32>
    %198 = tpu.matmul %195, %196, %cst_48 {dimension_numbers = #tpu.dot_dimension_numbers<[1], [1], [0], [0], [0, 0, 1, 0], [], []>} : vector<2x16xf32>, vector<2x16xf32>, vector<2x2xf32> -> vector<2x2xf32>
    %cst_49 = arith.constant dense<0xFF800000> : vector<2xf32>
    %199 = vector.multi_reduction <maximumf>, %198, %cst_49 [1] : vector<2x2xf32> to vector<2xf32>
    %200 = vector.shape_cast %199 : vector<2xf32> to vector<2x1xf32>
    %201 = vector.broadcast %200 : vector<2x1xf32> to vector<2x2xf32>
    %202 = arith.subf %198, %201 : vector<2x2xf32>
    %203 = math.exp %202 : vector<2x2xf32>
    %cst_50 = arith.constant dense<0.000000e+00> : vector<2xf32>
    %204 = vector.multi_reduction <add>, %203, %cst_50 [1] : vector<2x2xf32> to vector<2xf32>
    %205 = vector.shape_cast %204 : vector<2xf32> to vector<2x1xf32>
    %206 = tpu.reciprocal %205 {approx = true} : vector<2x1xf32> -> vector<2x1xf32>
    %207 = vector.broadcast %206 : vector<2x1xf32> to vector<2x2xf32>
    %208 = arith.mulf %203, %207 : vector<2x2xf32>
    %209 = arith.truncf %208 : vector<2x2xf32> to vector<2x2xbf16>
    %210 = arith.truncf %197 : vector<2x16xf32> to vector<2x16xbf16>
    %cst_51 = arith.constant dense<0.000000e+00> : vector<2x16xf32>
    %211 = tpu.matmul %209, %210, %cst_51 {dimension_numbers = #tpu.dot_dimension_numbers<[1], [0], [0], [1], [0, 0, 1, 1], [], []>} : vector<2x2xbf16>, vector<2x16xbf16>, vector<2x16xf32> -> vector<2x16xf32>
    %212 = vector.extract_strided_slice %19 {offsets = [10, 16], sizes = [2, 16], strides = [1, 1]} : vector<16x96xf32> to vector<2x16xf32>
    %213 = vector.extract_strided_slice %19 {offsets = [10, 48], sizes = [2, 16], strides = [1, 1]} : vector<16x96xf32> to vector<2x16xf32>
    %214 = vector.extract_strided_slice %19 {offsets = [10, 80], sizes = [2, 16], strides = [1, 1]} : vector<16x96xf32> to vector<2x16xf32>
    %cst_52 = arith.constant dense<0.000000e+00> : vector<2x2xf32>
    %215 = tpu.matmul %212, %213, %cst_52 {dimension_numbers = #tpu.dot_dimension_numbers<[1], [1], [0], [0], [0, 0, 1, 0], [], []>} : vector<2x16xf32>, vector<2x16xf32>, vector<2x2xf32> -> vector<2x2xf32>
    %cst_53 = arith.constant dense<0xFF800000> : vector<2xf32>
    %216 = vector.multi_reduction <maximumf>, %215, %cst_53 [1] : vector<2x2xf32> to vector<2xf32>
    %217 = vector.shape_cast %216 : vector<2xf32> to vector<2x1xf32>
    %218 = vector.broadcast %217 : vector<2x1xf32> to vector<2x2xf32>
    %219 = arith.subf %215, %218 : vector<2x2xf32>
    %220 = math.exp %219 : vector<2x2xf32>
    %cst_54 = arith.constant dense<0.000000e+00> : vector<2xf32>
    %221 = vector.multi_reduction <add>, %220, %cst_54 [1] : vector<2x2xf32> to vector<2xf32>
    %222 = vector.shape_cast %221 : vector<2xf32> to vector<2x1xf32>
    %223 = tpu.reciprocal %222 {approx = true} : vector<2x1xf32> -> vector<2x1xf32>
    %224 = vector.broadcast %223 : vector<2x1xf32> to vector<2x2xf32>
    %225 = arith.mulf %220, %224 : vector<2x2xf32>
    %226 = arith.truncf %225 : vector<2x2xf32> to vector<2x2xbf16>
    %227 = arith.truncf %214 : vector<2x16xf32> to vector<2x16xbf16>
    %cst_55 = arith.constant dense<0.000000e+00> : vector<2x16xf32>
    %228 = tpu.matmul %226, %227, %cst_55 {dimension_numbers = #tpu.dot_dimension_numbers<[1], [0], [0], [1], [0, 0, 1, 1], [], []>} : vector<2x2xbf16>, vector<2x16xbf16>, vector<2x16xf32> -> vector<2x16xf32>
    %229 = tpu.concatenate %211, %228 in 1 : vector<2x16xf32>, vector<2x16xf32> -> vector<2x32xf32>
    %230 = vector.extract_strided_slice %19 {offsets = [12, 0], sizes = [2, 16], strides = [1, 1]} : vector<16x96xf32> to vector<2x16xf32>
    %231 = vector.extract_strided_slice %19 {offsets = [12, 32], sizes = [2, 16], strides = [1, 1]} : vector<16x96xf32> to vector<2x16xf32>
    %232 = vector.extract_strided_slice %19 {offsets = [12, 64], sizes = [2, 16], strides = [1, 1]} : vector<16x96xf32> to vector<2x16xf32>
    %cst_56 = arith.constant dense<0.000000e+00> : vector<2x2xf32>
    %233 = tpu.matmul %230, %231, %cst_56 {dimension_numbers = #tpu.dot_dimension_numbers<[1], [1], [0], [0], [0, 0, 1, 0], [], []>} : vector<2x16xf32>, vector<2x16xf32>, vector<2x2xf32> -> vector<2x2xf32>
    %cst_57 = arith.constant dense<0xFF800000> : vector<2xf32>
    %234 = vector.multi_reduction <maximumf>, %233, %cst_57 [1] : vector<2x2xf32> to vector<2xf32>
    %235 = vector.shape_cast %234 : vector<2xf32> to vector<2x1xf32>
    %236 = vector.broadcast %235 : vector<2x1xf32> to vector<2x2xf32>
    %237 = arith.subf %233, %236 : vector<2x2xf32>
    %238 = math.exp %237 : vector<2x2xf32>
    %cst_58 = arith.constant dense<0.000000e+00> : vector<2xf32>
    %239 = vector.multi_reduction <add>, %238, %cst_58 [1] : vector<2x2xf32> to vector<2xf32>
    %240 = vector.shape_cast %239 : vector<2xf32> to vector<2x1xf32>
    %241 = tpu.reciprocal %240 {approx = true} : vector<2x1xf32> -> vector<2x1xf32>
    %242 = vector.broadcast %241 : vector<2x1xf32> to vector<2x2xf32>
    %243 = arith.mulf %238, %242 : vector<2x2xf32>
    %244 = arith.truncf %243 : vector<2x2xf32> to vector<2x2xbf16>
    %245 = arith.truncf %232 : vector<2x16xf32> to vector<2x16xbf16>
    %cst_59 = arith.constant dense<0.000000e+00> : vector<2x16xf32>
    %246 = tpu.matmul %244, %245, %cst_59 {dimension_numbers = #tpu.dot_dimension_numbers<[1], [0], [0], [1], [0, 0, 1, 1], [], []>} : vector<2x2xbf16>, vector<2x16xbf16>, vector<2x16xf32> -> vector<2x16xf32>
    %247 = vector.extract_strided_slice %19 {offsets = [12, 16], sizes = [2, 16], strides = [1, 1]} : vector<16x96xf32> to vector<2x16xf32>
    %248 = vector.extract_strided_slice %19 {offsets = [12, 48], sizes = [2, 16], strides = [1, 1]} : vector<16x96xf32> to vector<2x16xf32>
    %249 = vector.extract_strided_slice %19 {offsets = [12, 80], sizes = [2, 16], strides = [1, 1]} : vector<16x96xf32> to vector<2x16xf32>
    %cst_60 = arith.constant dense<0.000000e+00> : vector<2x2xf32>
    %250 = tpu.matmul %247, %248, %cst_60 {dimension_numbers = #tpu.dot_dimension_numbers<[1], [1], [0], [0], [0, 0, 1, 0], [], []>} : vector<2x16xf32>, vector<2x16xf32>, vector<2x2xf32> -> vector<2x2xf32>
    %cst_61 = arith.constant dense<0xFF800000> : vector<2xf32>
    %251 = vector.multi_reduction <maximumf>, %250, %cst_61 [1] : vector<2x2xf32> to vector<2xf32>
    %252 = vector.shape_cast %251 : vector<2xf32> to vector<2x1xf32>
    %253 = vector.broadcast %252 : vector<2x1xf32> to vector<2x2xf32>
    %254 = arith.subf %250, %253 : vector<2x2xf32>
    %255 = math.exp %254 : vector<2x2xf32>
    %cst_62 = arith.constant dense<0.000000e+00> : vector<2xf32>
    %256 = vector.multi_reduction <add>, %255, %cst_62 [1] : vector<2x2xf32> to vector<2xf32>
    %257 = vector.shape_cast %256 : vector<2xf32> to vector<2x1xf32>
    %258 = tpu.reciprocal %257 {approx = true} : vector<2x1xf32> -> vector<2x1xf32>
    %259 = vector.broadcast %258 : vector<2x1xf32> to vector<2x2xf32>
    %260 = arith.mulf %255, %259 : vector<2x2xf32>
    %261 = arith.truncf %260 : vector<2x2xf32> to vector<2x2xbf16>
    %262 = arith.truncf %249 : vector<2x16xf32> to vector<2x16xbf16>
    %cst_63 = arith.constant dense<0.000000e+00> : vector<2x16xf32>
    %263 = tpu.matmul %261, %262, %cst_63 {dimension_numbers = #tpu.dot_dimension_numbers<[1], [0], [0], [1], [0, 0, 1, 1], [], []>} : vector<2x2xbf16>, vector<2x16xbf16>, vector<2x16xf32> -> vector<2x16xf32>
    %264 = tpu.concatenate %246, %263 in 1 : vector<2x16xf32>, vector<2x16xf32> -> vector<2x32xf32>
    %265 = vector.extract_strided_slice %19 {offsets = [14, 0], sizes = [2, 16], strides = [1, 1]} : vector<16x96xf32> to vector<2x16xf32>
    %266 = vector.extract_strided_slice %19 {offsets = [14, 32], sizes = [2, 16], strides = [1, 1]} : vector<16x96xf32> to vector<2x16xf32>
    %267 = vector.extract_strided_slice %19 {offsets = [14, 64], sizes = [2, 16], strides = [1, 1]} : vector<16x96xf32> to vector<2x16xf32>
    %cst_64 = arith.constant dense<0.000000e+00> : vector<2x2xf32>
    %268 = tpu.matmul %265, %266, %cst_64 {dimension_numbers = #tpu.dot_dimension_numbers<[1], [1], [0], [0], [0, 0, 1, 0], [], []>} : vector<2x16xf32>, vector<2x16xf32>, vector<2x2xf32> -> vector<2x2xf32>
    %cst_65 = arith.constant dense<0xFF800000> : vector<2xf32>
    %269 = vector.multi_reduction <maximumf>, %268, %cst_65 [1] : vector<2x2xf32> to vector<2xf32>
    %270 = vector.shape_cast %269 : vector<2xf32> to vector<2x1xf32>
    %271 = vector.broadcast %270 : vector<2x1xf32> to vector<2x2xf32>
    %272 = arith.subf %268, %271 : vector<2x2xf32>
    %273 = math.exp %272 : vector<2x2xf32>
    %cst_66 = arith.constant dense<0.000000e+00> : vector<2xf32>
    %274 = vector.multi_reduction <add>, %273, %cst_66 [1] : vector<2x2xf32> to vector<2xf32>
    %275 = vector.shape_cast %274 : vector<2xf32> to vector<2x1xf32>
    %276 = tpu.reciprocal %275 {approx = true} : vector<2x1xf32> -> vector<2x1xf32>
    %277 = vector.broadcast %276 : vector<2x1xf32> to vector<2x2xf32>
    %278 = arith.mulf %273, %277 : vector<2x2xf32>
    %279 = arith.truncf %278 : vector<2x2xf32> to vector<2x2xbf16>
    %280 = arith.truncf %267 : vector<2x16xf32> to vector<2x16xbf16>
    %cst_67 = arith.constant dense<0.000000e+00> : vector<2x16xf32>
    %281 = tpu.matmul %279, %280, %cst_67 {dimension_numbers = #tpu.dot_dimension_numbers<[1], [0], [0], [1], [0, 0, 1, 1], [], []>} : vector<2x2xbf16>, vector<2x16xbf16>, vector<2x16xf32> -> vector<2x16xf32>
    %282 = vector.extract_strided_slice %19 {offsets = [14, 16], sizes = [2, 16], strides = [1, 1]} : vector<16x96xf32> to vector<2x16xf32>
    %283 = vector.extract_strided_slice %19 {offsets = [14, 48], sizes = [2, 16], strides = [1, 1]} : vector<16x96xf32> to vector<2x16xf32>
    %284 = vector.extract_strided_slice %19 {offsets = [14, 80], sizes = [2, 16], strides = [1, 1]} : vector<16x96xf32> to vector<2x16xf32>
    %cst_68 = arith.constant dense<0.000000e+00> : vector<2x2xf32>
    %285 = tpu.matmul %282, %283, %cst_68 {dimension_numbers = #tpu.dot_dimension_numbers<[1], [1], [0], [0], [0, 0, 1, 0], [], []>} : vector<2x16xf32>, vector<2x16xf32>, vector<2x2xf32> -> vector<2x2xf32>
    %cst_69 = arith.constant dense<0xFF800000> : vector<2xf32>
    %286 = vector.multi_reduction <maximumf>, %285, %cst_69 [1] : vector<2x2xf32> to vector<2xf32>
    %287 = vector.shape_cast %286 : vector<2xf32> to vector<2x1xf32>
    %288 = vector.broadcast %287 : vector<2x1xf32> to vector<2x2xf32>
    %289 = arith.subf %285, %288 : vector<2x2xf32>
    %290 = math.exp %289 : vector<2x2xf32>
    %cst_70 = arith.constant dense<0.000000e+00> : vector<2xf32>
    %291 = vector.multi_reduction <add>, %290, %cst_70 [1] : vector<2x2xf32> to vector<2xf32>
    %292 = vector.shape_cast %291 : vector<2xf32> to vector<2x1xf32>
    %293 = tpu.reciprocal %292 {approx = true} : vector<2x1xf32> -> vector<2x1xf32>
    %294 = vector.broadcast %293 : vector<2x1xf32> to vector<2x2xf32>
    %295 = arith.mulf %290, %294 : vector<2x2xf32>
    %296 = arith.truncf %295 : vector<2x2xf32> to vector<2x2xbf16>
    %297 = arith.truncf %284 : vector<2x16xf32> to vector<2x16xbf16>
    %cst_71 = arith.constant dense<0.000000e+00> : vector<2x16xf32>
    %298 = tpu.matmul %296, %297, %cst_71 {dimension_numbers = #tpu.dot_dimension_numbers<[1], [0], [0], [1], [0, 0, 1, 1], [], []>} : vector<2x2xbf16>, vector<2x16xbf16>, vector<2x16xf32> -> vector<2x16xf32>
    %299 = tpu.concatenate %281, %298 in 1 : vector<2x16xf32>, vector<2x16xf32> -> vector<2x32xf32>
    %300 = tpu.concatenate %54, %89, %124, %159, %194, %229, %264, %299 in 0 : vector<2x32xf32>, vector<2x32xf32>, vector<2x32xf32>, vector<2x32xf32>, vector<2x32xf32>, vector<2x32xf32>, vector<2x32xf32>, vector<2x32xf32> -> vector<16x32xf32>
    %301 = arith.truncf %300 : vector<16x32xf32> to vector<16x32xbf16>
    %c0_72 = arith.constant 0 : index
    %c0_73 = arith.constant 0 : index
    %c0_74 = arith.constant 0 : index
    %302 = vector.load %arg5[%c0_72, %c0_73, %c0_74] : memref<1x32x32xbf16, #tpu.memory_space<vmem>>, vector<1x32x32xbf16>
    %303 = vector.shape_cast %302 : vector<1x32x32xbf16> to vector<32x32xbf16>
    %cst_75 = arith.constant dense<0.000000e+00> : vector<16x32xf32>
    %304 = tpu.matmul %301, %303, %cst_75 {dimension_numbers = #tpu.dot_dimension_numbers<[1], [0], [0], [1], [0, 0, 1, 1], [], []>} : vector<16x32xbf16>, vector<32x32xbf16>, vector<16x32xf32> -> vector<16x32xf32>
    %305 = vector.broadcast %6 : vector<1x32xf32> to vector<16x32xf32>
    %306 = arith.addf %304, %305 : vector<16x32xf32>
    %307 = arith.addf %13, %306 : vector<16x32xf32>
    %cst_76 = arith.constant dense<0.000000e+00> : vector<16xf32>
    %308 = vector.multi_reduction <add>, %307, %cst_76 [1] : vector<16x32xf32> to vector<16xf32>
    %309 = vector.shape_cast %308 : vector<16xf32> to vector<16x1xf32>
    %cst_77 = arith.constant 3.200000e+01 : f32
    %310 = vector.broadcast %cst_77 : f32 to vector<16x1xf32>
    %311 = arith.divf %309, %310 : vector<16x1xf32>
    %312 = vector.broadcast %311 : vector<16x1xf32> to vector<16x32xf32>
    %313 = arith.subf %307, %312 : vector<16x32xf32>
    %314 = arith.mulf %313, %313 : vector<16x32xf32>
    %cst_78 = arith.constant dense<0.000000e+00> : vector<16xf32>
    %315 = vector.multi_reduction <add>, %314, %cst_78 [1] : vector<16x32xf32> to vector<16xf32>
    %316 = vector.shape_cast %315 : vector<16xf32> to vector<16x1xf32>
    %cst_79 = arith.constant 3.200000e+01 : f32
    %317 = vector.broadcast %cst_79 : f32 to vector<16x1xf32>
    %318 = arith.divf %316, %317 : vector<16x1xf32>
    %319 = vector.broadcast %311 : vector<16x1xf32> to vector<16x32xf32>
    %320 = arith.subf %307, %319 : vector<16x32xf32>
    %cst_80 = arith.constant 9.99999974E-6 : f32
    %321 = vector.broadcast %cst_80 : f32 to vector<16x1xf32>
    %322 = arith.addf %318, %321 : vector<16x1xf32>
    %323 = math.rsqrt %322 : vector<16x1xf32>
    %324 = vector.broadcast %323 : vector<16x1xf32> to vector<16x32xf32>
    %325 = arith.mulf %320, %324 : vector<16x32xf32>
    %326 = vector.broadcast %7 : vector<1x32xf32> to vector<16x32xf32>
    %327 = arith.mulf %325, %326 : vector<16x32xf32>
    %328 = vector.broadcast %8 : vector<1x32xf32> to vector<16x32xf32>
    %329 = arith.addf %327, %328 : vector<16x32xf32>
    %330 = arith.truncf %329 : vector<16x32xf32> to vector<16x32xbf16>
    %c0_81 = arith.constant 0 : index
    %c0_82 = arith.constant 0 : index
    %c0_83 = arith.constant 0 : index
    %331 = vector.load %arg6[%c0_81, %c0_82, %c0_83] : memref<1x32x128xbf16, #tpu.memory_space<vmem>>, vector<1x32x128xbf16>
    %332 = vector.shape_cast %331 : vector<1x32x128xbf16> to vector<32x128xbf16>
    %cst_84 = arith.constant dense<0.000000e+00> : vector<16x128xf32>
    %333 = tpu.matmul %330, %332, %cst_84 {dimension_numbers = #tpu.dot_dimension_numbers<[1], [0], [0], [1], [0, 0, 1, 1], [], []>} : vector<16x32xbf16>, vector<32x128xbf16>, vector<16x128xf32> -> vector<16x128xf32>
    %334 = vector.broadcast %9 : vector<1x128xf32> to vector<16x128xf32>
    %335 = arith.addf %333, %334 : vector<16x128xf32>
    %cst_85 = arith.constant 0.000000e+00 : f32
    %336 = vector.broadcast %cst_85 : f32 to vector<16x128xf32>
    %337 = arith.maximumf %335, %336 : vector<16x128xf32>
    %338 = arith.truncf %337 : vector<16x128xf32> to vector<16x128xbf16>
    %c0_86 = arith.constant 0 : index
    %c0_87 = arith.constant 0 : index
    %c0_88 = arith.constant 0 : index
    %339 = vector.load %arg7[%c0_86, %c0_87, %c0_88] : memref<1x128x32xbf16, #tpu.memory_space<vmem>>, vector<1x128x32xbf16>
    %340 = vector.shape_cast %339 : vector<1x128x32xbf16> to vector<128x32xbf16>
    %cst_89 = arith.constant dense<0.000000e+00> : vector<16x32xf32>
    %341 = tpu.matmul %338, %340, %cst_89 {dimension_numbers = #tpu.dot_dimension_numbers<[1], [0], [0], [1], [0, 0, 1, 1], [], []>} : vector<16x128xbf16>, vector<128x32xbf16>, vector<16x32xf32> -> vector<16x32xf32>
    %342 = vector.broadcast %10 : vector<1x32xf32> to vector<16x32xf32>
    %343 = arith.addf %341, %342 : vector<16x32xf32>
    %344 = arith.addf %329, %343 : vector<16x32xf32>
    %cst_90 = arith.constant dense<0.000000e+00> : vector<16xf32>
    %345 = vector.multi_reduction <add>, %344, %cst_90 [1] : vector<16x32xf32> to vector<16xf32>
    %346 = vector.shape_cast %345 : vector<16xf32> to vector<16x1xf32>
    %cst_91 = arith.constant 3.200000e+01 : f32
    %347 = vector.broadcast %cst_91 : f32 to vector<16x1xf32>
    %348 = arith.divf %346, %347 : vector<16x1xf32>
    %349 = vector.broadcast %348 : vector<16x1xf32> to vector<16x32xf32>
    %350 = arith.subf %344, %349 : vector<16x32xf32>
    %351 = arith.mulf %350, %350 : vector<16x32xf32>
    %cst_92 = arith.constant dense<0.000000e+00> : vector<16xf32>
    %352 = vector.multi_reduction <add>, %351, %cst_92 [1] : vector<16x32xf32> to vector<16xf32>
    %353 = vector.shape_cast %352 : vector<16xf32> to vector<16x1xf32>
    %cst_93 = arith.constant 3.200000e+01 : f32
    %354 = vector.broadcast %cst_93 : f32 to vector<16x1xf32>
    %355 = arith.divf %353, %354 : vector<16x1xf32>
    %356 = vector.broadcast %348 : vector<16x1xf32> to vector<16x32xf32>
    %357 = arith.subf %344, %356 : vector<16x32xf32>
    %cst_94 = arith.constant 9.99999974E-6 : f32
    %358 = vector.broadcast %cst_94 : f32 to vector<16x1xf32>
    %359 = arith.addf %355, %358 : vector<16x1xf32>
    %360 = math.rsqrt %359 : vector<16x1xf32>
    %361 = vector.broadcast %360 : vector<16x1xf32> to vector<16x32xf32>
    %362 = arith.mulf %357, %361 : vector<16x32xf32>
    %363 = vector.broadcast %11 : vector<1x32xf32> to vector<16x32xf32>
    %364 = arith.mulf %362, %363 : vector<16x32xf32>
    %365 = vector.broadcast %12 : vector<1x32xf32> to vector<16x32xf32>
    %366 = arith.addf %364, %365 : vector<16x32xf32>
    %c0_95 = arith.constant 0 : index
    %c0_96 = arith.constant 0 : index
    %367 = vector.load %arg11[%c0_95, %c0_96] : memref<16x32xf32, #tpu.memory_space<vmem>>, vector<16x32xf32>
    tpu.vector_store %arg11[%c0_95, %c0_96], %366 {strides = array<i32>} : memref<16x32xf32, #tpu.memory_space<vmem>>, vector<16x32xf32>,
    %c1_i32 = arith.constant 1 : i32
    %368 = arith.cmpi eq, %arg0, %c1_i32 : i32
    %369 = arith.extui %368 : i1 to i32
    %c0_i32_97 = arith.constant 0 : i32
    %370 = arith.cmpi ne, %369, %c0_i32_97 : i32
    scf.if %370 {
      %371 = vector.extract_strided_slice %366 {offsets = [0, 0], sizes = [2, 32], strides = [1, 1]} : vector<16x32xf32> to vector<2x32xf32>
      %372 = vector.extract_strided_slice %366 {offsets = [2, 0], sizes = [2, 32], strides = [1, 1]} : vector<16x32xf32> to vector<2x32xf32>
      %373 = arith.addf %371, %372 : vector<2x32xf32>
      %374 = vector.extract_strided_slice %366 {offsets = [4, 0], sizes = [2, 32], strides = [1, 1]} : vector<16x32xf32> to vector<2x32xf32>
      %375 = arith.addf %373, %374 : vector<2x32xf32>
      %376 = vector.extract_strided_slice %366 {offsets = [6, 0], sizes = [2, 32], strides = [1, 1]} : vector<16x32xf32> to vector<2x32xf32>
      %377 = arith.addf %375, %376 : vector<2x32xf32>
      %378 = vector.extract_strided_slice %366 {offsets = [8, 0], sizes = [2, 32], strides = [1, 1]} : vector<16x32xf32> to vector<2x32xf32>
      %379 = arith.addf %377, %378 : vector<2x32xf32>
      %380 = vector.extract_strided_slice %366 {offsets = [10, 0], sizes = [2, 32], strides = [1, 1]} : vector<16x32xf32> to vector<2x32xf32>
      %381 = arith.addf %379, %380 : vector<2x32xf32>
      %382 = vector.extract_strided_slice %366 {offsets = [12, 0], sizes = [2, 32], strides = [1, 1]} : vector<16x32xf32> to vector<2x32xf32>
      %383 = arith.addf %381, %382 : vector<2x32xf32>
      %384 = vector.extract_strided_slice %366 {offsets = [14, 0], sizes = [2, 32], strides = [1, 1]} : vector<16x32xf32> to vector<2x32xf32>
      %385 = arith.addf %383, %384 : vector<2x32xf32>
      %cst_98 = arith.constant 1.250000e-01 : f32
      %386 = vector.broadcast %cst_98 : f32 to vector<2x32xf32>
      %387 = arith.mulf %385, %386 : vector<2x32xf32>
      %c0_99 = arith.constant 0 : index
      %c0_100 = arith.constant 0 : index
      %388 = vector.load %arg9[%c0_99, %c0_100] : memref<33x4xf32, #tpu.memory_space<vmem>>, vector<33x4xf32>
      %389 = vector.extract_strided_slice %388 {offsets = [0, 0], sizes = [32, 4], strides = [1, 1]} : vector<33x4xf32> to vector<32x4xf32>
      %cst_101 = arith.constant dense<0.000000e+00> : vector<2x4xf32>
      %390 = tpu.matmul %387, %389, %cst_101 {dimension_numbers = #tpu.dot_dimension_numbers<[1], [0], [0], [1], [0, 0, 1, 1], [], []>} : vector<2x32xf32>, vector<32x4xf32>, vector<2x4xf32> -> vector<2x4xf32>
      %391 = vector.extract_strided_slice %388 {offsets = [32, 0], sizes = [1, 4], strides = [1, 1]} : vector<33x4xf32> to vector<1x4xf32>
      %392 = vector.broadcast %391 : vector<1x4xf32> to vector<2x4xf32>
      %393 = arith.addf %390, %392 : vector<2x4xf32>
      %c0_102 = arith.constant 0 : index
      %c0_103 = arith.constant 0 : index
      %394 = vector.load %arg10[%c0_102, %c0_103] : memref<2x4xf32, #tpu.memory_space<vmem>>, vector<2x4xf32>
      tpu.vector_store %arg10[%c0_102, %c0_103], %393 {strides = array<i32>} : memref<2x4xf32, #tpu.memory_space<vmem>>, vector<2x4xf32>,
    } else {
    }
    return
  }
  func.func @transform_0(%arg0: i32) -> (i32, i32) {
    %c0_i32 = arith.constant 0 : i32
    %c0_i32_0 = arith.constant 0 : i32
    %c0_i32_1 = arith.constant 0 : i32
    return %c0_i32, %c0_i32_0 : i32, i32
  }
  func.func @transform_1(%arg0: i32) -> (i32, i32) {
    %c0_i32 = arith.constant 0 : i32
    %c0_i32_0 = arith.constant 0 : i32
    %c0_i32_1 = arith.constant 0 : i32
    return %c0_i32, %c0_i32_0 : i32, i32
  }
  func.func @transform_2(%arg0: i32) -> (i32, i32) {
    %c0_i32 = arith.constant 0 : i32
    %c0_i32_0 = arith.constant 0 : i32
    %c0_i32_1 = arith.constant 0 : i32
    return %c0_i32, %c0_i32_0 : i32, i32
  }
  func.func @transform_3(%arg0: i32) -> (i32, i32, i32) {
    %c0_i32 = arith.constant 0 : i32
    %c0_i32_0 = arith.constant 0 : i32
    %c0_i32_1 = arith.constant 0 : i32
    return %arg0, %c0_i32, %c0_i32_0 : i32, i32, i32
  }
  func.func @transform_4(%arg0: i32) -> (i32, i32, i32) {
    %c0_i32 = arith.constant 0 : i32
    %c0_i32_0 = arith.constant 0 : i32
    %c0_i32_1 = arith.constant 0 : i32
    return %arg0, %c0_i32, %c0_i32_0 : i32, i32, i32
  }
  func.func @transform_5(%arg0: i32) -> (i32, i32, i32) {
    %c0_i32 = arith.constant 0 : i32
    %c0_i32_0 = arith.constant 0 : i32
    %c0_i32_1 = arith.constant 0 : i32
    return %arg0, %c0_i32, %c0_i32_0 : i32, i32, i32
  }
  func.func @transform_6(%arg0: i32) -> (i32, i32, i32) {
    %c0_i32 = arith.constant 0 : i32
    %c0_i32_0 = arith.constant 0 : i32
    %c0_i32_1 = arith.constant 0 : i32
    return %arg0, %c0_i32, %c0_i32_0 : i32, i32, i32
  }
  func.func @transform_7(%arg0: i32) -> (i32, i32, i32) {
    %c0_i32 = arith.constant 0 : i32
    %c0_i32_0 = arith.constant 0 : i32
    %c0_i32_1 = arith.constant 0 : i32
    return %arg0, %c0_i32, %c0_i32_0 : i32, i32, i32
  }
  func.func @transform_8(%arg0: i32) -> (i32, i32) {
    %c0_i32 = arith.constant 0 : i32
    %c0_i32_0 = arith.constant 0 : i32
    %c0_i32_1 = arith.constant 0 : i32
    return %c0_i32, %c0_i32_0 : i32, i32
  }
  func.func @transform_9(%arg0: i32) -> (i32, i32) {
    %c0_i32 = arith.constant 0 : i32
    %c0_i32_0 = arith.constant 0 : i32
    %c0_i32_1 = arith.constant 0 : i32
    return %c0_i32, %c0_i32_0 : i32, i32
  }
}

</mosaic_0001>

<bundles_post_ra>
// kernel: coverage_classifier_forward.1
= control target key start
LH: loop header
LB: loop body
LE: loop exit
PB: predicated region body
PF: predicated region fallthrough
CT: control target
= control target key end

     0   :  { %14 = vsyncpa [#allocation4], 0  ;;  %s2377_s30 = smov 0   ;;  %s2766_s0 = inlined_call_operand.vmem [shape: f32[16,16], index: 0, kind: input, shape index: {}]   ;;  %s2767_s1 = inlined_call_operand.vmem [shape: bf16[16,32], index: 1, kind: input, shape index: {}]   ;;  %s2768_s2 = inlined_call_operand.vmem [shape: f32[3,32], index: 2, kind: input, shape index: {}]   ;;  %s2769_s3 = inlined_call_operand.vmem [shape: bf16[2,32,96], index: 3, kind: input, shape index: {}]   ;;  %s2770_s4 = inlined_call_operand.vmem [shape: bf16[2,32,32], index: 4, kind: input, shape index: {}]   ;;  %s2771_s5 = inlined_call_operand.vmem [shape: bf16[2,32,128], index: 5, kind: input, shape index: {}]   ;;  %s2772_s6 = inlined_call_operand.vmem [shape: bf16[2,128,32], index: 6, kind: input, shape index: {}]   ;;  %s2773_s7 = inlined_call_operand.vmem [shape: f32[2,8,128], index: 7, kind: input, shape index: {}]   ;;  %s2774_s8 = inlined_call_operand.vmem [shape: f32[33,4], index: 8, kind: input, shape index: {}]   ;;  %s2775_s9 = inlined_call_operand.hbm [shape: f32[2,4], index: 9, kind: output, shape index: {}]  }
   0x1 LB: > { %s2383_s10 = sadd.s32 4294967295, %s2316_s30   ;;  %p2003_p0 = scmp.ge.s32.totalorder %s2316_s30, 1  ;;  %s2316_s30 = sphi %s2377_s30, %s20_s30  }
   0x2   : > { %p322_p1 = scmp.lt.s32.totalorder %s2316_s30, 3 }
   0x4   : > { %p323_p2 = pnand %p2003_p0, %p322_p1 }
   0x5   : > { %p372_p3 = scmp.lt.s32.totalorder (!%p323_p2), %s2383_s10, 1  ;;  %p2013_p4 = scmp.ne.s32.totalorder (!%p323_p2), %s2383_s10, 0 }
   0x6   : > { %326 = sbr.rel (%p323_p2) target bundleno = 4156 (0x103c), region = 56 }
   0xb   : > { %s373_s11 = scalar_select %p372_p3, %s2383_s10, 1 }
   0xd   : > { %s2132_s12 = sshll.u32 %s373_s11, 4  ;;  %s2135_s13 = sshll.u32 %s373_s11, 6 }
   0xe   : > { %s2392_s16 = scalar_lea.vmem %s2769_s3, %s2132_s12  ;;  %s2397_s19 = scalar_lea.vmem %s2770_s4, %s2132_s12 }
   0xf   : > { %s2402_s22 = scalar_lea.vmem %s2771_s5, %s2132_s12  ;;  %s2407_s25 = scalar_lea.vmem %s2772_s6, %s2135_s13 }
  0x10   : > { %s2012_s26 = sshll.u32 %s373_s11, 3  ;;  %400 = sbr.rel (%p2013_p4) target bundleno = 432 (0x1b0), region = 60 }
  0x11   : > { %s2412_s29 = scalar_lea.vmem %s2773_s7, %s2012_s26 }
  0x15   : > { %v2136_v0 = vld [vmem:[%s2767_s1] sm:$0xff]  ;;  %v403_v2 = vld [vmem:[%s2766_s0 + $0x8] sm:$0xff]  ;;  %vm414_vm0 = vcmask 130048   ;;  %vm434_vm1 = vcmask 261120   ;;  %v2318_v14 = vmov 32.0  }
  0x16   : > { %v402_v1 = vld [vmem:[%s2766_s0] sm:$0xff]  ;;  %425 = vmatpush.bf16.msra.mxu0 %v2136_v0  ;;  %2174 = vrcp.f32 %v2318_v14 }
  0x17   : > { %v404_v3 = vpack.c.bf16 %v403_v2, %v402_v1  ;;  %v2427_v4 = vld [vmem:[%s2768_s2] sm:$0x7] }
  0x18   : > { %v407_v5 = vperm.slane %v2427_v4, 0  ;;  %v486_v45 = vperm.slane %v2427_v4, 1  ;;  %v489_v48 = vperm.slane %v2427_v4, 2 }
  0x19   : > { %2018 = vmatmul.msk.bf16.vlgmr.msra.gmra.mxu0 %vm414_vm0, %v404_v3 }
  0x1c   : > { %v2175_v15 = vpop.eup %2174 }
  0x1d   : > { %v442_v16 = vmul.f32 32.0, %v2175_v15  ;;  %vm446_vm2 = vweird.f32 %v2175_v15 }
  0x1f   : > { %v443_v17 = vsub.f32 1.0, %v442_v16 }
  0x21   : > { %v444_v18 = vmul.f32 %v2175_v15, %v443_v17 }
  0x23   : > { %v445_v19 = vadd.f32 %v2175_v15, %v444_v18 }
  0x25   : > { %v447_v20 = vsel %vm446_vm2, %v2175_v15, %v445_v19 }
  0x96   : > { %v427_v6 = vpop.f32.mrf.mxu0 }
  0x97   : > { %v428_v7 = vadd.f32 %v427_v6, %v407_v5 }
  0x99   : > { %v432_v8 = vmax.f32 %v428_v7, 0.0 }
  0x9b   : > { %v435_v9 = vsel %vm434_vm1, %v432_v8, 0.0 }
  0x9c   : > { %436 = vadd.xlane.f32.xlu0 %v435_v9 }
  0x9e   : > { %v429_v10 = vpop.f32.mrf.mxu0 }
  0x9f   : > { %v430_v11 = vadd.f32 %v429_v10, %v407_v5 }
  0xa1   : > { %v433_v12 = vmax.f32 %v430_v11, 0.0 }
  0xa3   : > { %v438_v13 = vsel %vm434_vm1, %v433_v12, 0.0 }
  0xa4   : > { %439 = vadd.xlane.f32.xlu0 %v438_v13 }
 0x10f   : > { %v437_v21 = vpop.xlane.xlu0 %436 }
 0x110   : > { %v448_v22 = vmul.f32 %v447_v20, %v437_v21 }
 0x112   : > { %v450_v23 = vsub.f32 %v432_v8, %v448_v22 }
 0x114   : > { %v452_v24 = vmul.f32 %v450_v23, %v450_v23 }
 0x116   : > { %v454_v25 = vsel %vm434_vm1, %v452_v24, 0.0 }
 0x117   : > { %455 = vadd.xlane.f32.xlu1 %v454_v25  ;;  %v440_v26 = vpop.xlane.xlu0 %439 }
 0x118   : > { %v449_v27 = vmul.f32 %v447_v20, %v440_v26 }
 0x11a   : > { %v451_v28 = vsub.f32 %v433_v12, %v449_v27 }
 0x11c   : > { %v453_v29 = vmul.f32 %v451_v28, %v451_v28 }
 0x11e   : > { %v457_v30 = vsel %vm434_vm1, %v453_v29, 0.0 }
 0x11f   : > { %458 = vadd.xlane.f32.xlu1 %v457_v30 }
 0x18a   : > { %v456_v31 = vpop.xlane.xlu1 %455 }
 0x18b   : > { %v460_v32 = vmul.f32 %v456_v31, %v447_v20 }
 0x18d   : > { %v462_v33 = vadd.f32 1e-05, %v460_v32 }
 0x18f   : > { %2176 = vrsqrt.f32 %v462_v33  ;;  %vm470_vm4 = vweird.f32 %v462_v33 }
 0x192   : > { %v459_v34 = vpop.xlane.xlu1 %458 }
 0x193   : > { %v461_v35 = vmul.f32 %v459_v34, %v447_v20 }
 0x195   : > { %v2177_v36 = vpop.eup %2176  ;;  %v463_v37 = vadd.f32 1e-05, %v461_v35 }
 0x196   : > { %v465_v38 = vmul.f32 %v2177_v36, %v462_v33  ;;  %vm471_vm3 = vweird.f32 %v2177_v36 }
 0x197   : > { %2178 = vrsqrt.f32 %v463_v37  ;;  %vm472_vm5 = vmor %vm470_vm4, %vm471_vm3  ;;  %vm480_vm7 = vweird.f32 %v463_v37 }
 0x198   : > { %v466_v39 = vmul.f32 %v2177_v36, %v465_v38 }
 0x19a   : > { %v467_v40 = vmul.f32 0.5, %v466_v39 }
 0x19c   : > { %v468_v41 = vsub.f32 1.5, %v467_v40 }
 0x19d   : > { %v2179_v42 = vpop.eup %2178 }
 0x19e   : > { %v469_v43 = vmul.f32 %v2177_v36, %v468_v41  ;;  %v475_v44 = vmul.f32 %v2179_v42, %v463_v37  ;;  %vm481_vm6 = vweird.f32 %v2179_v42 }
 0x19f   : > { %vm482_vm8 = vmor %vm480_vm7, %vm481_vm6 }
 0x1a0   : > { %v473_v46 = vsel %vm472_vm5, %v2177_v36, %v469_v43  ;;  %v476_v47 = vmul.f32 %v2179_v42, %v475_v44 }
 0x1a1   : > { %v484_v49 = vmul.f32 %v473_v46, %v450_v23 }
 0x1a2   : > { %v477_v50 = vmul.f32 0.5, %v476_v47 }
 0x1a3   : > { %v487_v51 = vmul.f32 %v486_v45, %v484_v49 }
 0x1a4   : > { %v478_v52 = vsub.f32 1.5, %v477_v50 }
 0x1a5   : > { %v490_v53 = vadd.f32 %v489_v48, %v487_v51 }
 0x1a6   : > { %v479_v54 = vmul.f32 %v2179_v42, %v478_v52 }
 0x1a7   : > { %492 = vst.msk [vmem:[#allocation2] sm:$0xff] %vm434_vm1, %v490_v53 }
 0x1a8   : > { %v483_v55 = vsel %vm482_vm8, %v2179_v42, %v479_v54 }
 0x1a9   : > { %v485_v56 = vmul.f32 %v483_v55, %v451_v28 }
 0x1ab   : > { %v488_v57 = vmul.f32 %v486_v45, %v485_v56 }
 0x1ad   : > { %v491_v58 = vadd.f32 %v489_v48, %v488_v57 }
 0x1af   : > { %493 = vst.msk [vmem:[#allocation2 + $0x8] sm:$0xff] %vm434_vm1, %v491_v58 }
 0x1b0 PF: > { %v2138_v59 = vld [vmem:[%s2392_s16 + $0x8] sm:$0xff]  ;;  %v2137_v60 = vld [vmem:[%s2392_s16] sm:$0xff]  ;;  %vm515_vm9 = vcmask 261120   ;;  %s2319_s21 = smov 112   ;;  %s2320_s23 = smov 96   ;;  %vm536_vm10 = vcmask 130048  }
 0x1b1   : > { %525 = vmatpush.bf16.msra.mxu0 %v2138_v59  ;;  %v495_v61 = vld [vmem:[#allocation2] sm:$0xff]  ;;  %s2321_s16 = smov 80   ;;  %vm561_vm11 = vcmask 9216   ;;  %s2322_s24 = smov 64   ;;  %vm582_vm12 = vcmask 1040384   ;;  %vm578_vm13 = vcmask 15360  }
 0x1b2   : > { %v2442_v0 = vld [vmem:[%s2412_s29] sm:$0xff]  ;;  %s2323_s26 = smov 48   ;;  %s2324_s27 = smov 16   ;;  %vm1573_vm14 = vcmask 1041408   ;;  %vm1575_vm15 = vcmask 1043456   ;;  %vm1577_vm0 = vcmask 1045504  }
 0x1b3   : > { %v502_v1 = vperm.slane %v2442_v0, 0  ;;  %p2126_p5 = scmp.ne.s32.totalorder %s2383_s10, 1 }
 0x1b5   : > { %526 = vmatpush.bf16.msra.mxu0 %v2137_v60 }
 0x1b6   : > { %v496_v62 = vld [vmem:[#allocation2 + $0x8] sm:$0xff] }
 0x1b7   : > { %v497_v63 = vpack.c.bf16 %v496_v62, %v495_v61 }
 0x1b9   : > { %2027 = vmatmul.msk.bf16.vlgmr.msra.gmra.mxu0 %vm515_vm9, %v497_v63 }
 0x236   : > { %v528_v2 = vpop.f32.mrf.mxu0 }
 0x237   : > { %v529_v3 = vadd.f32 %v528_v2, %v502_v1 }
 0x239   : > { %599 = vrot.lane.b32.xlu1 %v529_v3, %s2319_s21  ;;  %534 = vrot.lane.b32.xlu0 %v529_v3, %s2320_s23  ;;  %v792_v4 = vrot.slane %v529_v3, 4  ;;  %v2448_v5 = vrot.slane %v529_v3, 2  ;;  %v2471_v21 = vpack.c.bf16 %v529_v3, %v529_v3  ;;  %v2475_v22 = vrot.slane %v529_v3, 6 }
 0x23b   : > { %793 = vrot.lane.b32.xlu2 %v792_v4, %s2320_s23  ;;  %v704_v23 = vrot.slane %v2471_v21, 1  ;;  %v958_v25 = vrot.slane %v2471_v21, 3  ;;  %v831_v47 = vrot.slane %v2471_v21, 2 }
 0x23e   : > { %v530_v28 = vpop.f32.mrf.mxu0 }
 0x23f   : > { %v2492_v30 = vadd.f32 %v530_v28, %v502_v1 }
 0x241   : > { %601 = vrot.lane.b32.xlu0 %v529_v3, %s2321_s16  ;;  %666 = vrot.lane.b32.xlu1 %v2448_v5, %s2320_s23 }
 0x243   : > { %855 = vrot.lane.b32.xlu2 %v792_v4, %s2321_s16 }
 0x249   : > { %853 = vrot.lane.b32.xlu0 %v792_v4, %s2319_s21 }
 0x295   : > { %v794_v6 = vpop.permute.xlu2 %793 }
 0x29d   : > { %v856_v9 = vpop.permute.xlu2 %855 }
 0x2ab   : > { %v600_v7 = vpop.permute.xlu1 %599  ;;  %v535_v8 = vpop.permute.xlu0 %534 }
 0x2ac   : > { %2028 = vmatpush.xpose.msk.msra.mxu1 %vm536_vm10, %v535_v8 }
 0x2af   : > { %2029 = vmatmul.msk.f32.vlgmr.msra.gmra.mxu1 %vm536_vm10, %v529_v3 }
 0x2b0   : > { %2040 = vmatpush.xpose.msk.msrb.mxu1 %vm536_vm10, %v794_v6 }
 0x2b3   : > { %v602_v10 = vpop.permute.xlu0 %601  ;;  %v667_v11 = vpop.permute.xlu1 %666 }
 0x2b4   : > { %2043 = vmatpush.xpose.msk.msra.mxu1 %vm536_vm10, %v856_v9  ;;  %2031 = vmatpush.xpose.msk.msra.mxu3 %vm536_vm10, %v602_v10 }
 0x2b7   : > { %2032 = vmatmul.msk.f32.vlgmr.msra.gmra.mxu3 %vm536_vm10, %v600_v7  ;;  %2041 = vmatmul.msk.f32.vlgmr.msrb.gmra.mxu1 %vm536_vm10, %v792_v4 }
 0x2b8   : > { %2034 = vmatpush.xpose.msk.msrb.mxu3 %vm536_vm10, %v667_v11 }
 0x2bb   : > { %v854_v12 = vpop.permute.xlu0 %853 }
 0x2bf   : > { %2035 = vmatmul.msk.f32.vlgmr.msrb.gmra.mxu3 %vm536_vm10, %v2448_v5  ;;  %2044 = vmatmul.msk.f32.vlgmr.msra.gmra.mxu1 %vm536_vm10, %v854_v12 }
 0x32c   : > { %v558_v13 = vpop.f32.mrf.mxu1 }
 0x32d   : > { %v562_v14 = vsel %vm561_vm11, %v558_v13, -inf }
 0x32e   : > { %563 = vmax.xlane.f32.xlu1 %v562_v14 }
 0x334   : > { %v816_v15 = vpop.f32.mrf.mxu1 }
 0x335   : > { %v819_v24 = vsel %vm561_vm11, %v816_v15, -inf }
 0x33a   : > { %v2467_v16 = vpop.f32.mrf.mxu3 }
 0x33c   : > { %v878_v17 = vpop.f32.mrf.mxu1 }
 0x33d   : > { %v881_v18 = vsel %vm561_vm11, %v878_v17, -inf }
 0x33e   : > { %882 = vmax.xlane.f32.xlu0 %v881_v18 }
 0x342   : > { %v689_v19 = vpop.f32.mrf.mxu3 }
 0x343   : > { %v692_v20 = vsel %vm561_vm11, %v689_v19, -inf }
 0x344   : > { %693 = vmax.xlane.f32.xlu2 %v692_v20 }
 0x347   : > { %576 = vrot.lane.b32.xlu1 %v2471_v21, %s2322_s24 }
 0x34f   : > { %920 = vrot.lane.b32.xlu1 %v2475_v22, %s2320_s23 }
 0x352   : > { %705 = vrot.lane.b32.xlu0 %v704_v23, %s2322_s24 }
 0x37c   : > { %820 = vmax.xlane.f32.xlu0 %v819_v24 }
 0x390   : > { %728 = vrot.lane.b32.xlu0 %v2448_v5, %s2321_s16 }
 0x398   : > { %959 = vrot.lane.b32.xlu0 %v958_v25, %s2322_s24 }
 0x3a0   : > { %982 = vrot.lane.b32.xlu0 %v2475_v22, %s2321_s16 }
 0x3a1   : > { %v564_v26 = vpop.xlane.xlu1 %563 }
 0x3a2   : > { %v565_v27 = vsub.f32 %v558_v13, %v564_v26 }
 0x3a4   : > { %v566_v29 = vmul.f32 1.442695, %v565_v27 }
 0x3a6   : > { %2200 = vpow2.f32 %v566_v29 }
 0x3a8   : > { %1110 = vrot.lane.b32.xlu0 %v2492_v30, %s2321_s16 }
 0x3ac   : > { %v2201_v31 = vpop.eup %2200 }
 0x3ad   : > { %v568_v32 = vsel %vm561_vm11, %v2201_v31, 0.0 }
 0x3ae   : > { %569 = vadd.xlane.f32.xlu2 %v568_v32 }
 0x3b0   : > { %1047 = vrot.lane.b32.xlu0 %v2492_v30, %s2320_s23 }
 0x3b1   : > { %v883_v33 = vpop.xlane.xlu0 %882 }
 0x3b2   : > { %v884_v37 = vsub.f32 %v878_v17, %v883_v33 }
 0x3b4   : > { %v885_v40 = vmul.f32 1.442695, %v884_v37 }
 0x3b7   : > { %v694_v34 = vpop.xlane.xlu2 %693 }
 0x3b8   : > { %v695_v35 = vsub.f32 %v689_v19, %v694_v34 }
 0x3b9   : > { %v577_v36 = vpop.permute.xlu1 %576 }
 0x3ba   : > { %v696_v38 = vmul.f32 1.442695, %v695_v35  ;;  %v584_v39 = vsel %vm582_vm12, %v577_v36, 0 }
 0x3bb   : > { %593 = vmatpush.bf16.msra.mxu2 %v584_v39 }
 0x3bc   : > { %2202 = vpow2.f32 %v696_v38 }
 0x3bd   : > { %2204 = vpow2.f32 %v885_v40 }
 0x3c1   : > { %v921_v7 = vpop.permute.xlu1 %920 }
 0x3c2   : > { %v2203_v41 = vpop.eup %2202 }
 0x3c3   : > { %v698_v42 = vsel %vm561_vm11, %v2203_v41, 0.0  ;;  %v2205_v45 = vpop.eup %2204 }
 0x3c4   : > { %699 = vadd.xlane.f32.xlu2 %v698_v42  ;;  %v706_v43 = vpop.permute.xlu0 %705  ;;  %v887_v46 = vsel %vm561_vm11, %v2205_v45, 0.0 }
 0x3c5   : > { %v711_v44 = vsel %vm582_vm12, %v706_v43, 0 }
 0x3c6   : > { %720 = vmatpush.bf16.msrb.mxu2 %v711_v44 }
 0x3cc   : > { %888 = vadd.xlane.f32.xlu2 %v887_v46 }
 0x3e4   : > { %893 = vrot.lane.b32.xlu2 %v831_v47, %s2323_s26 }
 0x3ef   : > { %v821_v48 = vpop.xlane.xlu0 %820 }
 0x3f0   : > { %v822_v49 = vsub.f32 %v816_v15, %v821_v48 }
 0x3f2   : > { %v823_v50 = vmul.f32 1.442695, %v822_v49 }
 0x3f4   : > { %2206 = vpow2.f32 %v823_v50 }
 0x3fa   : > { %v2506_v52 = vpop.eup %2206 }
 0x3fb   : > { %v825_v55 = vsel %vm561_vm11, %v2506_v52, 0.0 }
 0x402   : > { %v729_v51 = vpop.permute.xlu0 %728 }
 0x403   : > { %2037 = vmatpush.xpose.msk.msra.mxu3 %vm536_vm10, %v729_v51 }
 0x40a   : > { %v960_v53 = vpop.permute.xlu0 %959 }
 0x40b   : > { %v965_v54 = vsel %vm582_vm12, %v960_v53, 0 }
 0x40c   : > { %974 = vmatpush.bf16.msrb.mxu1 %v965_v54  ;;  %v2555_v54 = vpack.c.bf16 %v2492_v30, %v2492_v30 }
 0x40d   : > { %826 = vadd.xlane.f32.xlu2 %v825_v55 }
 0x412   : > { %v983_v56 = vpop.permute.xlu0 %982 }
 0x41a   : > { %v1111_v57 = vpop.permute.xlu0 %1110 }
 0x41b   : > { %2055 = vmatpush.xpose.msk.msra.mxu1 %vm536_vm10, %v1111_v57 }
 0x421   : > { %v570_v58 = vpop.xlane.xlu2 %569 }
 0x422   : > { %2208 = vrcp.f32 %v570_v58  ;;  %v1048_v11 = vpop.permute.xlu0 %1047 }
 0x425   : > { %832 = vrot.lane.b32.xlu2 %v831_v47, %s2322_s24 }
 0x428   : > { %v2209_v59 = vpop.eup %2208 }
 0x429   : > { %v572_v60 = vmul.f32 %v2209_v59, %v2201_v31 }
 0x42b   : > { %v573_v61 = vpack.c.bf16 %v572_v60, %v572_v60 }
 0x42d   : > { %2030 = vmatmul.msk.bf16.vlgmr.msra.gmra.mxu2 %vm578_vm13, %v573_v61  ;;  %1108 = vrot.lane.b32.xlu2 %v2492_v30, %s2319_s21 }
 0x437   : > { %v700_v62 = vpop.xlane.xlu2 %699 }
 0x438   : > { %2210 = vrcp.f32 %v700_v62 }
 0x43e   : > { %v2211_v63 = vpop.eup %2210 }
 0x43f   : > { %v702_v1 = vmul.f32 %v2211_v63, %v2203_v41  ;;  %v889_v2 = vpop.xlane.xlu2 %888 }
 0x440   : > { %2212 = vrcp.f32 %v889_v2 }
 0x441   : > { %v703_v3 = vpack.c.bf16 %v702_v1, %v702_v1 }
 0x443   : > { %2036 = vmatmul.msk.bf16.vlgmr.msrb.gmra.mxu2 %vm578_vm13, %v703_v3 }
 0x446   : > { %v2213_v8 = vpop.eup %2212 }
 0x447   : > { %v894_v4 = vpop.permute.xlu2 %893  ;;  %v891_v9 = vmul.f32 %v2213_v8, %v2205_v45 }
 0x448   : > { %v899_v6 = vsel %vm582_vm12, %v894_v4, 0  ;;  %v2573_v4 = vrot.slane %v2492_v30, 4 }
 0x449   : > { %908 = vmatpush.bf16.msra.mxu2 %v899_v6  ;;  %v892_v10 = vpack.c.bf16 %v891_v9, %v891_v9 }
 0x44d   : > { %2046 = vmatpush.xpose.msk.msrb.mxu2 %vm536_vm10, %v921_v7 }
 0x453   : > { %2045 = vmatmul.msk.bf16.vlgmr.msra.gmra.mxu2 %vm578_vm13, %v892_v10 }
 0x454   : > { %2052 = vmatpush.xpose.msk.msra.mxu2 %vm536_vm10, %v1048_v11 }
 0x463   : > { %2047 = vmatmul.msk.f32.vlgmr.msrb.gmra.mxu2 %vm536_vm10, %v2475_v22 }
 0x46b   : > { %2053 = vmatmul.msk.f32.vlgmr.msra.gmra.mxu2 %vm536_vm10, %v2492_v30 }
 0x480   : > { %v827_v12 = vpop.xlane.xlu2 %826 }
 0x488   : > { %v833_v13 = vpop.permute.xlu2 %832 }
 0x489   : > { %v838_v14 = vsel %vm582_vm12, %v833_v13, 0 }
 0x48a   : > { %847 = vmatpush.bf16.msrb.mxu3 %v838_v14 }
 0x490   : > { %v1109_v43 = vpop.permute.xlu2 %1108 }
 0x4b0   : > { %v2526_v15 = vpop.f32.mrf.mxu2 }
 0x4b8   : > { %v597_v17 = vpop.f32.mrf.mxu2 }
 0x4c6   : > { %v2528_v18 = vpop.f32.mrf.mxu2 }
 0x4ce   : > { %v724_v19 = vpop.f32.mrf.mxu2 }
 0x4d6   : > { %v2530_v20 = vpop.f32.mrf.mxu2 }
 0x4de   : > { %v912_v24 = vpop.f32.mrf.mxu2 }
 0x4e6   : > { %v943_v26 = vpop.f32.mrf.mxu2 }
 0x4e7   : > { %v946_v27 = vsel %vm561_vm11, %v943_v26, -inf }
 0x4e8   : > { %947 = vmax.xlane.f32.xlu1 %v946_v27 }
 0x501   : > { %726 = vrot.lane.b32.xlu1 %v2448_v5, %s2319_s21  ;;  %v627_v5 = vsel %vm561_vm11, %v2467_v16, -inf }
 0x55b   : > { %v948_v28 = vpop.xlane.xlu1 %947 }
 0x55c   : > { %v949_v29 = vsub.f32 %v943_v26, %v948_v28 }
 0x55e   : > { %v950_v31 = vmul.f32 1.442695, %v949_v29 }
 0x560   : > { %2214 = vpow2.f32 %v950_v31 }
 0x561   : > { %2216 = vrcp.f32 %v827_v12 }
 0x566   : > { %v2215_v32 = vpop.eup %2214 }
 0x567   : > { %v952_v33 = vsel %vm561_vm11, %v2215_v32, 0.0  ;;  %v2217_v34 = vpop.eup %2216 }
 0x568   : > { %953 = vadd.xlane.f32.xlu1 %v952_v33  ;;  %v829_v36 = vmul.f32 %v2217_v34, %v2506_v52  ;;  %v1070_v52 = vpop.f32.mrf.mxu2 }
 0x569   : > { %v1073_v53 = vsel %vm561_vm11, %v1070_v52, -inf }
 0x56a   : > { %v830_v37 = vpack.c.bf16 %v829_v36, %v829_v36  ;;  %v1174_v36 = vrot.slane %v2492_v30, 2 }
 0x573   : > { %v727_v35 = vpop.permute.xlu1 %726 }
 0x574   : > { %2038 = vmatmul.msk.f32.vlgmr.msra.gmra.mxu3 %vm536_vm10, %v727_v35 }
 0x575   : > { %2049 = vmatpush.xpose.msk.msra.mxu3 %vm536_vm10, %v983_v56 }
 0x57c   : > { %2042 = vmatmul.msk.bf16.vlgmr.msrb.gmra.mxu3 %vm578_vm13, %v830_v37 }
 0x581   : > { %980 = vrot.lane.b32.xlu1 %v2475_v22, %s2319_s21 }
 0x5ab   : > { %628 = vmax.xlane.f32.xlu1 %v627_v5 }
 0x5db   : > { %v954_v38 = vpop.xlane.xlu1 %953 }
 0x5dc   : > { %2218 = vrcp.f32 %v954_v38 }
 0x5e2   : > { %v2219_v39 = vpop.eup %2218 }
 0x5e3   : > { %v956_v40 = vmul.f32 %v2219_v39, %v2215_v32 }
 0x5e5   : > { %v957_v41 = vpack.c.bf16 %v956_v40, %v956_v40 }
 0x5e7   : > { %2048 = vmatmul.msk.bf16.vlgmr.msrb.gmra.mxu1 %vm578_vm13, %v957_v41 }
 0x5f3   : > { %v981_v42 = vpop.permute.xlu1 %980 }
 0x5f4   : > { %2050 = vmatmul.msk.f32.vlgmr.msra.gmra.mxu3 %vm536_vm10, %v981_v42 }
 0x5f7   : > { %v751_v44 = vpop.f32.mrf.mxu3  ;;  %2056 = vmatmul.msk.f32.vlgmr.msra.gmra.mxu1 %vm536_vm10, %v1109_v43 }
 0x5f8   : > { %v754_v22 = vsel %vm561_vm11, %v751_v44, -inf }
 0x5f9   : > { %755 = vmax.xlane.f32.xlu2 %v754_v22 }
 0x5ff   : > { %v2548_v45 = vpop.f32.mrf.mxu3 }
 0x607   : > { %v851_v46 = vpop.f32.mrf.mxu3 }
 0x61e   : > { %v629_v47 = vpop.xlane.xlu1 %628 }
 0x61f   : > { %v630_v48 = vsub.f32 %v2467_v16, %v629_v47 }
 0x621   : > { %v631_v49 = vmul.f32 1.442695, %v630_v48 }
 0x623   : > { %2220 = vpow2.f32 %v631_v49 }
 0x629   : > { %v2221_v50 = vpop.eup %2220 }
 0x62a   : > { %v633_v51 = vsel %vm561_vm11, %v2221_v50, 0.0 }
 0x62b   : > { %634 = vadd.xlane.f32.xlu2 %v633_v51 }
 0x633   : > { %1074 = vmax.xlane.f32.xlu2 %v1073_v53 }
 0x64b   : > { %1148 = vrot.lane.b32.xlu2 %v2555_v54, %s2323_s26 }
 0x664   : > { %v2559_v55 = vpop.f32.mrf.mxu1 }
 0x66c   : > { %v756_v16 = vpop.xlane.xlu2 %755  ;;  %v978_v56 = vpop.f32.mrf.mxu1 }
 0x66d   : > { %v757_v57 = vsub.f32 %v751_v44, %v756_v16 }
 0x66f   : > { %v758_v58 = vmul.f32 1.442695, %v757_v57 }
 0x671   : > { %2222 = vpow2.f32 %v758_v58 }
 0x674   : > { %v1133_v59 = vpop.f32.mrf.mxu1 }
 0x675   : > { %v1136_v60 = vsel %vm561_vm11, %v1133_v59, -inf }
 0x676   : > { %1137 = vmax.xlane.f32.xlu0 %v1136_v60 }
 0x677   : > { %v1005_v61 = vpop.f32.mrf.mxu3  ;;  %v2223_v63 = vpop.eup %2222 }
 0x678   : > { %v1008_v62 = vsel %vm561_vm11, %v1005_v61, -inf  ;;  %v760_v1 = vsel %vm561_vm11, %v2223_v63, 0.0 }
 0x679   : > { %1009 = vmax.xlane.f32.xlu1 %v1008_v62 }
 0x681   : > { %761 = vadd.xlane.f32.xlu1 %v760_v1 }
 0x68a   : > { %639 = vrot.lane.b32.xlu0 %v2471_v21, %s2323_s26 }
 0x69a   : > { %766 = vrot.lane.b32.xlu1 %v704_v23, %s2323_s26 }
 0x69e   : > { %v635_v2 = vpop.xlane.xlu2 %634 }
 0x6a2   : > { %1020 = vrot.lane.b32.xlu1 %v958_v25, %s2323_s26 }
 0x6a6   : > { %v1075_v3 = vpop.xlane.xlu2 %1074 }
 0x6a7   : > { %v1076_v8 = vsub.f32 %v1070_v52, %v1075_v3 }
 0x6a9   : > { %v1077_v9 = vmul.f32 1.442695, %v1076_v8 }
 0x6aa   : > { %1302 = vrot.lane.b32.xlu1 %v2573_v4, %s2320_s23 }
 0x6ab   : > { %2224 = vpow2.f32 %v1077_v9 }
 0x6ae   : > { %v1149_v6 = vpop.permute.xlu2 %1148 }
 0x6af   : > { %v1154_v7 = vsel %vm582_vm12, %v1149_v6, 0 }
 0x6b0   : > { %1163 = vmatpush.bf16.msrb.mxu2 %v1154_v7 }
 0x6b1   : > { %v2225_v23 = vpop.eup %2224 }
 0x6b2   : > { %v1079_v10 = vsel %vm561_vm11, %v2225_v23, 0.0 }
 0x6d4   : > { %1080 = vadd.xlane.f32.xlu1 %v1079_v10 }
 0x6e9   : > { %v1138_v21 = vpop.xlane.xlu0 %1137 }
 0x6ea   : > { %v1139_v25 = vsub.f32 %v1133_v59, %v1138_v21 }
 0x6ec   : > { %v1140_v11 = vmul.f32 1.442695, %v1139_v25  ;;  %v1010_v12 = vpop.xlane.xlu1 %1009 }
 0x6ed   : > { %v1011_v13 = vsub.f32 %v1005_v61, %v1010_v12  ;;  %v1213_v12 = vrot.slane %v2555_v54, 1 }
 0x6ee   : > { %2226 = vpow2.f32 %v1140_v11 }
 0x6ef   : > { %v1012_v14 = vmul.f32 1.442695, %v1011_v13  ;;  %v2621_v13 = vrot.slane %v2492_v30, 6 }
 0x6f1   : > { %2228 = vpow2.f32 %v1012_v14 }
 0x6f2   : > { %2230 = vrcp.f32 %v635_v2 }
 0x6f4   : > { %v2227_v17 = vpop.eup %2226  ;;  %v762_v32 = vpop.xlane.xlu1 %761 }
 0x6f5   : > { %v1142_v19 = vsel %vm561_vm11, %v2227_v17, 0.0  ;;  %2232 = vrcp.f32 %v762_v32 }
 0x6f6   : > { %1143 = vadd.xlane.f32.xlu2 %v1142_v19 }
 0x6f7   : > { %v2229_v24 = vpop.eup %2228 }
 0x6f8   : > { %v2231_v26 = vpop.eup %2230  ;;  %v1014_v27 = vsel %vm561_vm11, %v2229_v24, 0.0 }
 0x6f9   : > { %1015 = vadd.xlane.f32.xlu0 %v1014_v27  ;;  %v637_v28 = vmul.f32 %v2231_v26, %v2221_v50 }
 0x6fb   : > { %v638_v33 = vpack.c.bf16 %v637_v28, %v637_v28  ;;  %v2233_v34 = vpop.eup %2232 }
 0x6fc   : > { %v640_v29 = vpop.permute.xlu0 %639  ;;  %v764_v35 = vmul.f32 %v2233_v34, %v2223_v63 }
 0x6fd   : > { %v645_v31 = vsel %vm582_vm12, %v640_v29, 0 }
 0x6fe   : > { %654 = vmatpush.bf16.msrb.mxu0 %v645_v31  ;;  %v765_v38 = vpack.c.bf16 %v764_v35, %v764_v35 }
 0x701   : > { %2033 = vmatmul.msk.bf16.vlgmr.msrb.gmra.mxu0 %vm578_vm13, %v638_v33 }
 0x70c   : > { %v767_v37 = vpop.permute.xlu1 %766 }
 0x70d   : > { %v772_v5 = vsel %vm582_vm12, %v767_v37, 0  ;;  %1235 = vrot.lane.b32.xlu0 %v1174_v36, %s2319_s21 }
 0x70e   : > { %1175 = vrot.lane.b32.xlu2 %v1174_v36, %s2320_s23  ;;  %781 = vmatpush.bf16.msra.mxu0 %v772_v5 }
 0x711   : > { %2039 = vmatmul.msk.bf16.vlgmr.msra.gmra.mxu0 %vm578_vm13, %v765_v38 }
 0x714   : > { %v1021_v39 = vpop.permute.xlu1 %1020 }
 0x715   : > { %v1026_v40 = vsel %vm582_vm12, %v1021_v39, 0 }
 0x716   : > { %1087 = vrot.lane.b32.xlu2 %v2555_v54, %s2322_s24  ;;  %1035 = vmatpush.bf16.msrb.mxu0 %v1026_v40 }
 0x71c   : > { %v1303_v41 = vpop.permute.xlu1 %1302 }
 0x71d   : > { %2064 = vmatpush.xpose.msk.msra.mxu2 %vm536_vm10, %v1303_v41 }
 0x71e   : > { %1237 = vrot.lane.b32.xlu2 %v1174_v36, %s2321_s16 }
 0x747   : > { %v1081_v43 = vpop.xlane.xlu1 %1080 }
 0x769   : > { %v1144_v42 = vpop.xlane.xlu2 %1143 }
 0x76a   : > { %2234 = vrcp.f32 %v1144_v42 }
 0x76c   : > { %v1016_v44 = vpop.xlane.xlu0 %1015 }
 0x76d   : > { %2236 = vrcp.f32 %v1016_v44 }
 0x76e   : > { %2238 = vrcp.f32 %v1081_v43 }
 0x770   : > { %v2235_v22 = vpop.eup %2234 }
 0x771   : > { %v1146_v46 = vmul.f32 %v2235_v22, %v2227_v17  ;;  %v1176_v47 = vpop.permute.xlu2 %1175 }
 0x772   : > { %2058 = vmatpush.xpose.msk.msra.mxu0 %vm536_vm10, %v1176_v47 }
 0x773   : > { %v2237_v48 = vpop.eup %2236  ;;  %v1147_v49 = vpack.c.bf16 %v1146_v46, %v1146_v46 }
 0x774   : > { %v1018_v50 = vmul.f32 %v2237_v48, %v2229_v24  ;;  %v2239_v51 = vpop.eup %2238 }
 0x775   : > { %2057 = vmatmul.msk.bf16.vlgmr.msrb.gmra.mxu2 %vm578_vm13, %v1147_v49  ;;  %v1083_v53 = vmul.f32 %v2239_v51, %v2225_v23 }
 0x776   : > { %v1019_v52 = vpack.c.bf16 %v1018_v50, %v1018_v50 }
 0x777   : > { %v1084_v57 = vpack.c.bf16 %v1083_v53, %v1083_v53 }
 0x778   : > { %2051 = vmatmul.msk.bf16.vlgmr.msrb.gmra.mxu0 %vm578_vm13, %v1019_v52 }
 0x779   : > { %v1088_v16 = vpop.permute.xlu2 %1087 }
 0x77a   : > { %v1093_v56 = vsel %vm582_vm12, %v1088_v16, 0 }
 0x77b   : > { %1102 = vmatpush.bf16.msrb.mxu3 %v1093_v56 }
 0x77e   : > { %v2597_v58 = vpop.f32.mrf.mxu0  ;;  %2054 = vmatmul.msk.bf16.vlgmr.msrb.gmra.mxu3 %vm578_vm13, %v1084_v57 }
 0x77f   : > { %v1236_v61 = vpop.permute.xlu0 %1235 }
 0x781   : > { %v1238_v59 = vpop.permute.xlu2 %1237 }
 0x782   : > { %2061 = vmatpush.xpose.msk.msra.mxu3 %vm536_vm10, %v1238_v59 }
 0x785   : > { %2065 = vmatmul.msk.f32.vlgmr.msra.gmra.mxu2 %vm536_vm10, %v2573_v4 }
 0x786   : > { %v658_v60 = vpop.f32.mrf.mxu0 }
 0x788   : > { %2059 = vmatmul.msk.f32.vlgmr.msra.gmra.mxu0 %vm536_vm10, %v1174_v36  ;;  %v1340_v36 = vrot.slane %v2555_v54, 2 }
 0x78e   : > { %v2604_v62 = vpop.f32.mrf.mxu0  ;;  %2062 = vmatmul.msk.f32.vlgmr.msra.gmra.mxu3 %vm536_vm10, %v1236_v61 }
 0x796   : > { %v785_v63 = vpop.f32.mrf.mxu0 }
 0x7f5   : > { %v2607_v1 = vpop.f32.mrf.mxu0 }
 0x7f8   : > { %v2609_v2 = vpop.f32.mrf.mxu2 }
 0x7fd   : > { %v1039_v3 = vpop.f32.mrf.mxu0 }
 0x800   : > { %v1167_v6 = vpop.f32.mrf.mxu2 }
 0x801   : > { %v2611_v7 = vpop.f32.mrf.mxu3 }
 0x805   : > { %v1198_v8 = vpop.f32.mrf.mxu0 }
 0x806   : > { %v1201_v9 = vsel %vm561_vm11, %v1198_v8, -inf }
 0x807   : > { %1202 = vmax.xlane.f32.xlu2 %v1201_v9 }
 0x808   : > { %v1325_v23 = vpop.f32.mrf.mxu2 }
 0x809   : > { %v1106_v10 = vpop.f32.mrf.mxu3  ;;  %v1328_v21 = vsel %vm561_vm11, %v1325_v23, -inf }
 0x80a   : > { %1329 = vmax.xlane.f32.xlu0 %v1328_v21 }
 0x811   : > { %v1260_v25 = vpop.f32.mrf.mxu3 }
 0x812   : > { %v1263_v11 = vsel %vm561_vm11, %v1260_v25, -inf }
 0x813   : > { %1264 = vmax.xlane.f32.xlu1 %v1263_v11 }
 0x81e   : > { %1364 = vrot.lane.b32.xlu0 %v2573_v4, %s2321_s16 }
 0x81f   : > { %1214 = vrot.lane.b32.xlu2 %v1213_v12, %s2322_s24 }
 0x827   : > { %1491 = vrot.lane.b32.xlu2 %v2621_v13, %s2321_s16 }
 0x82f   : > { %1489 = vrot.lane.b32.xlu2 %v2621_v13, %s2319_s21 }
 0x837   : > { %1429 = vrot.lane.b32.xlu2 %v2621_v13, %s2320_s23 }
 0x87a   : > { %v1203_v14 = vpop.xlane.xlu2 %1202 }
 0x87b   : > { %v1204_v17 = vsub.f32 %v1198_v8, %v1203_v14 }
 0x87d   : > { %v1205_v19 = vmul.f32 1.442695, %v1204_v17  ;;  %v1330_v31 = vpop.xlane.xlu0 %1329 }
 0x87e   : > { %v1331_v37 = vsub.f32 %v1325_v23, %v1330_v31 }
 0x87f   : > { %2240 = vpow2.f32 %v1205_v19 }
 0x880   : > { %v1332_v5 = vmul.f32 1.442695, %v1331_v37 }
 0x882   : > { %v1215_v24 = vpop.permute.xlu2 %1214 }
 0x883   : > { %v1220_v26 = vsel %vm582_vm12, %v1215_v24, 0 }
 0x884   : > { %1229 = vmatpush.bf16.msrb.mxu1 %v1220_v26 }
 0x885   : > { %v2241_v27 = vpop.eup %2240 }
 0x886   : > { %v1265_v30 = vpop.xlane.xlu1 %1264  ;;  %v1207_v28 = vsel %vm561_vm11, %v2241_v27, 0.0 }
 0x887   : > { %v1266_v29 = vsub.f32 %v1260_v25, %v1265_v30  ;;  %1208 = vadd.xlane.f32.xlu1 %v1207_v28 }
 0x889   : > { %v1267_v32 = vmul.f32 1.442695, %v1266_v29 }
 0x88a   : > { %v1492_v46 = vpop.permute.xlu2 %1491 }
 0x88b   : > { %2242 = vpow2.f32 %v1267_v32 }
 0x88c   : > { %2244 = vpow2.f32 %v1332_v5 }
 0x890   : > { %v1365_v33 = vpop.permute.xlu0 %1364 }
 0x891   : > { %v2243_v34 = vpop.eup %2242  ;;  %2067 = vmatpush.xpose.msk.msra.mxu1 %vm536_vm10, %v1365_v33 }
 0x892   : > { %v1269_v35 = vsel %vm561_vm11, %v2243_v34, 0.0  ;;  %v2245_v38 = vpop.eup %2244  ;;  %v1490_v51 = vpop.permute.xlu2 %1489 }
 0x893   : > { %1270 = vadd.xlane.f32.xlu0 %v1269_v35  ;;  %v1334_v39 = vsel %vm561_vm11, %v2245_v38, 0.0 }
 0x89a   : > { %v1430_v59 = vpop.permute.xlu2 %1429 }
 0x8a0   : > { %1341 = vrot.lane.b32.xlu1 %v1340_v36, %s2322_s24 }
 0x8ca   : > { %1335 = vadd.xlane.f32.xlu1 %v1334_v39  ;;  %v2190_v39 = vpack.i.bf16 %v2607_v1, %v2597_v58 }
 0x8e3   : > { %1362 = vrot.lane.b32.xlu1 %v2573_v4, %s2319_s21 }
 0x8eb   : > { %1275 = vrot.lane.b32.xlu1 %v1213_v12, %s2323_s26 }
 0x8fa   : > { %v1209_v40 = vpop.xlane.xlu1 %1208 }
 0x8fb   : > { %2246 = vrcp.f32 %v1209_v40 }
 0x901   : > { %v2247_v41 = vpop.eup %2246 }
 0x902   : > { %v1211_v42 = vmul.f32 %v2247_v41, %v2241_v27 }
 0x904   : > { %v1212_v43 = vpack.c.bf16 %v1211_v42, %v1211_v42 }
 0x906   : > { %2060 = vmatmul.msk.bf16.vlgmr.msrb.gmra.mxu1 %vm578_vm13, %v1212_v43  ;;  %v1271_v50 = vpop.xlane.xlu0 %1270 }
 0x912   : > { %v1342_v44 = vpop.permute.xlu1 %1341 }
 0x913   : > { %v1347_v22 = vsel %vm582_vm12, %v1342_v44, 0 }
 0x914   : > { %1356 = vmatpush.bf16.msrb.mxu3 %v1347_v22 }
 0x918   : > { %2073 = vmatpush.xpose.msk.msra.mxu3 %vm536_vm10, %v1492_v46 }
 0x93d   : > { %v1336_v47 = vpop.xlane.xlu1 %1335 }
 0x93e   : > { %2248 = vrcp.f32 %v1336_v47 }
 0x93f   : > { %2250 = vrcp.f32 %v1271_v50 }
 0x944   : > { %v2249_v48 = vpop.eup %2248 }
 0x945   : > { %v1338_v4 = vmul.f32 %v2249_v48, %v2245_v38  ;;  %v2251_v53 = vpop.eup %2250 }
 0x946   : > { %v1273_v16 = vmul.f32 %v2251_v53, %v2243_v34 }
 0x947   : > { %v1339_v49 = vpack.c.bf16 %v1338_v4, %v1338_v4 }
 0x948   : > { %v1274_v60 = vpack.c.bf16 %v1273_v16, %v1273_v16 }
 0x949   : > { %2066 = vmatmul.msk.bf16.vlgmr.msrb.gmra.mxu3 %vm578_vm13, %v1339_v49 }
 0x955   : > { %v1363_v52 = vpop.permute.xlu1 %1362 }
 0x956   : > { %2068 = vmatmul.msk.f32.vlgmr.msra.gmra.mxu1 %vm536_vm10, %v1363_v52 }
 0x959   : > { %2074 = vmatmul.msk.f32.vlgmr.msra.gmra.mxu3 %vm536_vm10, %v1490_v51 }
 0x95d   : > { %v1276_v56 = vpop.permute.xlu1 %1275 }
 0x95e   : > { %v1281_v57 = vsel %vm582_vm12, %v1276_v56, 0 }
 0x95f   : > { %1290 = vmatpush.bf16.msrb.mxu0 %v1281_v57 }
 0x962   : > { %2063 = vmatmul.msk.bf16.vlgmr.msrb.gmra.mxu0 %vm578_vm13, %v1274_v60 }
 0x963   : > { %2070 = vmatpush.xpose.msk.msra.mxu0 %vm536_vm10, %v1430_v59 }
 0x972   : > { %2071 = vmatmul.msk.f32.vlgmr.msra.gmra.mxu0 %vm536_vm10, %v2621_v13 }
 0x983   : > { %v2650_v61 = vpop.f32.mrf.mxu1 }
 0x98b   : > { %v1233_v63 = vpop.f32.mrf.mxu1 }
 0x98c   : > { %v2140_v63 = vld [vmem:[%s2397_s19 + $0x8] sm:$0xff] }
 0x9cc   : > { %v2652_v3 = vpop.f32.mrf.mxu3 }
 0x9d3   : > { %v1387_v6 = vpop.f32.mrf.mxu1 }
 0x9d4   : > { %v1360_v8 = vpop.f32.mrf.mxu3  ;;  %v1390_v9 = vsel %vm561_vm11, %v1387_v6, -inf }
 0x9d5   : > { %1391 = vmax.xlane.f32.xlu1 %v1390_v9 }
 0x9dc   : > { %v1514_v23 = vpop.f32.mrf.mxu3 }
 0x9dd   : > { %v1517_v10 = vsel %vm561_vm11, %v1514_v23, -inf }
 0x9de   : > { %1518 = vmax.xlane.f32.xlu2 %v1517_v10 }
 0x9df   : > { %v1292_v21 = vpop.f32.mrf.mxu0 }
 0x9e0   : > { %v2180_v5 = vpack.i.bf16 %v1292_v21, %v2604_v62 }
 0x9e7   : > { %v1294_v25 = vpop.f32.mrf.mxu0 }
 0x9ee   : > { %1402 = vrot.lane.b32.xlu1 %v1340_v36, %s2323_s26  ;;  %v1467_v36 = vrot.slane %v2555_v54, 3 }
 0x9ef   : > { %v1452_v11 = vpop.f32.mrf.mxu0 }
 0x9f0   : > { %v1455_v12 = vsel %vm561_vm11, %v1452_v11, -inf }
 0x9f1   : > { %1456 = vmax.xlane.f32.xlu0 %v1455_v12 }
 0xa48   : > { %v1392_v13 = vpop.xlane.xlu1 %1391 }
 0xa49   : > { %v1393_v14 = vsub.f32 %v1387_v6, %v1392_v13  ;;  %v2139_v6 = vld [vmem:[%s2397_s19] sm:$0xff] }
 0xa4b   : > { %v1394_v17 = vmul.f32 1.442695, %v1393_v14 }
 0xa4d   : > { %2252 = vpow2.f32 %v1394_v17 }
 0xa51   : > { %v1519_v19 = vpop.xlane.xlu2 %1518 }
 0xa52   : > { %v1520_v24 = vsub.f32 %v1514_v23, %v1519_v19 }
 0xa53   : > { %v2253_v26 = vpop.eup %2252 }
 0xa54   : > { %v1521_v27 = vmul.f32 1.442695, %v1520_v24  ;;  %v1396_v30 = vsel %vm561_vm11, %v2253_v26, 0.0 }
 0xa55   : > { %1397 = vadd.xlane.f32.xlu0 %v1396_v30 }
 0xa56   : > { %2254 = vpow2.f32 %v1521_v27 }
 0xa5c   : > { %v2255_v28 = vpop.eup %2254 }
 0xa5d   : > { %v1523_v29 = vsel %vm561_vm11, %v2255_v28, 0.0 }
 0xa5e   : > { %1524 = vadd.xlane.f32.xlu2 %v1523_v29 }
 0xa60   : > { %v1403_v31 = vpop.permute.xlu1 %1402 }
 0xa61   : > { %v1408_v32 = vsel %vm582_vm12, %v1403_v31, 0 }
 0xa62   : > { %1417 = vmatpush.bf16.msrb.mxu2 %v1408_v32 }
 0xa64   : > { %v1457_v33 = vpop.xlane.xlu0 %1456 }
 0xa65   : > { %v1458_v34 = vsub.f32 %v1452_v11, %v1457_v33 }
 0xa66   : > { %1609 = vmatpush.bf16.msra.mxu2 %v2140_v63 }
 0xa67   : > { %v1459_v35 = vmul.f32 1.442695, %v1458_v34 }
 0xa69   : > { %2256 = vpow2.f32 %v1459_v35  ;;  %1529 = vrot.lane.b32.xlu0 %v1467_v36, %s2323_s26 }
 0xa6a   : > { %1610 = vmatpush.bf16.msra.mxu2 %v2139_v6 }
 0xa6f   : > { %v2257_v37 = vpop.eup %2256 }
 0xa70   : > { %v1461_v38 = vsel %vm561_vm11, %v2257_v37, 0.0 }
 0xa71   : > { %2181 = vrot.lane.b32.xlu0 %v2180_v5, %s2324_s27  ;;  %1462 = vadd.xlane.f32.xlu2 %v1461_v38  ;;  %v1587_v5 = vperm.slane %v2442_v0, 1 }
 0xa79   : > { %2191 = vrot.lane.b32.xlu0 %v2190_v39, %s2324_s27 }
 0xa89   : > { %1468 = vrot.lane.b32.xlu2 %v1467_v36, %s2322_s24 }
 0xac8   : > { %v1398_v54 = vpop.xlane.xlu0 %1397 }
 0xac9   : > { %2258 = vrcp.f32 %v1398_v54  ;;  %v2274_v54 = vld [vmem:[#allocation2] sm:$0xff] }
 0xacf   : > { %v2259_v40 = vpop.eup %2258 }
 0xad0   : > { %v1400_v41 = vmul.f32 %v2259_v40, %v2253_v26 }
 0xad1   : > { %v1525_v42 = vpop.xlane.xlu2 %1524 }
 0xad2   : > { %v1401_v43 = vpack.c.bf16 %v1400_v41, %v1400_v41  ;;  %2260 = vrcp.f32 %v1525_v42 }
 0xad4   : > { %2069 = vmatmul.msk.bf16.vlgmr.msrb.gmra.mxu2 %vm578_vm13, %v1401_v43  ;;  %v2275_v43 = vld [vmem:[#allocation2 + $0x8] sm:$0xff] }
 0xad8   : > { %v2261_v62 = vpop.eup %2260 }
 0xad9   : > { %v1527_v44 = vmul.f32 %v2261_v62, %v2255_v28 }
 0xadb   : > { %v1530_v22 = vpop.permute.xlu0 %1529  ;;  %v1528_v58 = vpack.c.bf16 %v1527_v44, %v1527_v44 }
 0xadc   : > { %v1535_v46 = vsel %vm582_vm12, %v1530_v22, 0  ;;  %v2325_v22 = vmov 32.0  }
 0xadd   : > { %1544 = vmatpush.bf16.msrb.mxu0 %v1535_v46 }
 0xae0   : > { %2075 = vmatmul.msk.bf16.vlgmr.msrb.gmra.mxu0 %vm578_vm13, %v1528_v58 }
 0xae3   : > { %v2182_v8 = vpop.permute.xlu0 %2181 }
 0xae4   : > { %v1463_v1 = vpop.xlane.xlu2 %1462  ;;  %v2183_v10 = vunpack.i.l.bf16 %v2182_v8  ;;  %v2184_v21 = vunpack.i.h.bf16 %v2182_v8 }
 0xae5   : > { %2262 = vrcp.f32 %v1463_v1 }
 0xae6   : > { %v791_v12 = vsel %vm536_vm10, %v2528_v18, %v2183_v10  ;;  %v1300_v14 = vsel %vm536_vm10, %v2650_v61, %v2184_v21  ;;  %2264 = vrcp.f32 %v2325_v22  ;;  %v2149_v21 = vld [vmem:[%s2407_s25 + $0x30] sm:$0xff] }
 0xae7   : > { %v1556_v24 = vrot.slane %v791_v12, 6  ;;  %v1565_v28 = vrot.slane %v1300_v14, 6  ;;  %v2148_v12 = vld [vmem:[%s2407_s25 + $0x28] sm:$0xff] }
 0xaeb   : > { %v2263_v47 = vpop.eup %2262  ;;  %v2192_v9 = vpop.permute.xlu0 %2191 }
 0xaec   : > { %v1465_v48 = vmul.f32 %v2263_v47, %v2257_v37  ;;  %v1469_v4 = vpop.permute.xlu2 %1468  ;;  %v2193_v25 = vunpack.i.l.bf16 %v2192_v9  ;;  %v2194_v13 = vunpack.i.h.bf16 %v2192_v9  ;;  %v2265_v46 = vpop.eup %2264  ;;  %v2141_v9 = vld [vmem:[%s2402_s22] sm:$0xff] }
 0xaed   : > { %v1474_v49 = vsel %vm582_vm12, %v1469_v4, 0  ;;  %v1626_v58 = vmul.f32 32.0, %v2265_v46  ;;  %vm1630_vm1 = vweird.f32 %v2265_v46 }
 0xaee   : > { %v1466_v50 = vpack.c.bf16 %v1465_v48, %v1465_v48  ;;  %1483 = vmatpush.bf16.msrb.mxu1 %v1474_v49  ;;  %v664_v17 = vsel %vm536_vm10, %v2526_v15, %v2193_v25 }
 0xaef   : > { %v1574_v29 = vsel %vm1573_vm14, %v664_v17, %v1556_v24  ;;  %v1627_v1 = vsub.f32 1.0, %v1626_v58  ;;  %v2147_v17 = vld [vmem:[%s2407_s25 + $0x20] sm:$0xff] }
 0xaf1   : > { %2072 = vmatmul.msk.bf16.vlgmr.msrb.gmra.mxu1 %vm578_vm13, %v1466_v50  ;;  %v1628_v0 = vmul.f32 %v2265_v46, %v1627_v1 }
 0xaf3   : > { %v1629_v47 = vadd.f32 %v2265_v46, %v1628_v0 }
 0xaf5   : > { %v2704_v48 = vsel %vm1630_vm1, %v2265_v46, %v1629_v47 }
 0xb57   : > { %v1419_v51 = vpop.f32.mrf.mxu2 }
 0xb58   : > { %v2185_v52 = vpack.i.bf16 %v1419_v51, %v2530_v20 }
 0xb5a   : > { %2186 = vrot.lane.b32.xlu1 %v2185_v52, %s2324_s27 }
 0xb5d   : > { %v1546_v53 = vpop.f32.mrf.mxu0 }
 0xb5e   : > { %v2195_v56 = vpack.i.bf16 %v1546_v53, %v2609_v2 }
 0xb5f   : > { %v1421_v16 = vpop.f32.mrf.mxu2 }
 0xb62   : > { %2196 = vrot.lane.b32.xlu1 %v2195_v56, %s2324_s27 }
 0xb65   : > { %v1548_v57 = vpop.f32.mrf.mxu0 }
 0xb6e   : > { %v1485_v59 = vpop.f32.mrf.mxu1 }
 0xb76   : > { %v1487_v60 = vpop.f32.mrf.mxu1 }
 0xb77   : > { %v2142_v60 = vld [vmem:[%s2402_s22 + $0x8] sm:$0xff] }
 0xb78   : > { %1703 = vmatpush.bf16.msrb.mxu3 %v2142_v60 }
 0xb7c   : > { %1704 = vmatpush.bf16.msrb.mxu3 %v2141_v9 }
 0xbcc   : > { %v2187_v23 = vpop.permute.xlu1 %2186 }
 0xbcd   : > { %v2188_v20 = vunpack.i.l.bf16 %v2187_v23  ;;  %v2189_v11 = vunpack.i.h.bf16 %v2187_v23  ;;  %v2150_v23 = vld [vmem:[%s2407_s25 + $0x38] sm:$0xff] }
 0xbce   : > { %1779 = vmatpush.bf16.msra.mxu1 %v2150_v23 }
 0xbcf   : > { %v918_v2 = vsel %vm536_vm10, %v2548_v45, %v2188_v20  ;;  %v1427_v26 = vsel %vm536_vm10, %v2652_v3, %v2189_v11  ;;  %v1045_v45 = vsel %vm536_vm10, %v2559_v55, %v2194_v13 }
 0xbd0   : > { %v1559_v19 = vrot.slane %v918_v2, 4  ;;  %v1568_v61 = vrot.slane %v1427_v26, 4  ;;  %v1562_v33 = vrot.slane %v1045_v45, 2 }
 0xbd2   : > { %v1576_v31 = vsel %vm1575_vm15, %v1574_v29, %v1559_v19  ;;  %1780 = vmatpush.bf16.msra.mxu1 %v2149_v21  ;;  %v2719_v29 = vld [vmem:[%s2412_s29] sm:$0xff] }
 0xbd3   : > { %v1578_v36 = vsel %vm1577_vm0, %v1576_v31, %v1562_v33  ;;  %v1673_v33 = vperm.slane %v2719_v29, 3  ;;  %v1730_v46 = vperm.slane %v2719_v29, 5 }
 0xbd4   : > { %v2197_v27 = vpop.permute.xlu1 %2196 }
 0xbd5   : > { %v2199_v30 = vunpack.i.h.bf16 %v2197_v27  ;;  %v2198_v18 = vunpack.i.l.bf16 %v2197_v27 }
 0xbd6   : > { %1781 = vmatpush.bf16.msra.mxu1 %v2148_v12 }
 0xbd7   : > { %v1554_v15 = vsel %vm536_vm10, %v1485_v59, %v2199_v30  ;;  %v1173_v32 = vsel %vm536_vm10, %v2611_v7, %v2198_v18 }
 0xbd8   : > { %v1571_v3 = vrot.slane %v1554_v15, 2  ;;  %v1579_v34 = vsel %vm1573_vm14, %v1173_v32, %v1565_v28 }
 0xbd9   : > { %v1580_v55 = vsel %vm1575_vm15, %v1579_v34, %v1568_v61  ;;  %v1670_v61 = vperm.slane %v2719_v29, 2 }
 0xbda   : > { %v1581_v35 = vsel %vm1577_vm0, %v1580_v55, %v1571_v3  ;;  %1782 = vmatpush.bf16.msra.mxu1 %v2147_v17 }
 0xbdb   : > { %v1582_v37 = vpack.c.bf16 %v1581_v35, %v1578_v36 }
 0xbdd   : > { %2084 = vmatmul.msk.bf16.vlgmr.msra.gmra.mxu2 %vm515_vm9, %v1582_v37 }
 0xc60   : > { %v1612_v38 = vpop.f32.mrf.mxu2 }
 0xc61   : > { %v1613_v39 = vadd.f32 %v1612_v38, %v1587_v5  ;;  %v2145_v38 = vld [vmem:[%s2407_s25 + $0x10] sm:$0xff] }
 0xc63   : > { %v1617_v40 = vadd.f32 %v2274_v54, %v1613_v39  ;;  %v2144_v39 = vld [vmem:[%s2407_s25 + $0x8] sm:$0xff]  ;;  %v2143_v54 = vld [vmem:[%s2407_s25] sm:$0xff] }
 0xc65   : > { %v1619_v41 = vsel %vm515_vm9, %v1617_v40, 0.0 }
 0xc66   : > { %1620 = vadd.xlane.f32.xlu0 %v1619_v41  ;;  %v1681_v41 = vperm.slane %v2719_v29, 4 }
 0xc68   : > { %v1614_v7 = vpop.f32.mrf.mxu2 }
 0xc69   : > { %v1615_v42 = vadd.f32 %v1614_v7, %v1587_v5  ;;  %v2146_v5 = vld [vmem:[%s2407_s25 + $0x18] sm:$0xff] }
 0xc6a   : > { %1783 = vmatpush.bf16.msra.mxu1 %v2146_v5 }
 0xc6b   : > { %v1618_v62 = vadd.f32 %v2275_v43, %v1615_v42 }
 0xc6d   : > { %v1622_v44 = vsel %vm515_vm9, %v1618_v62, 0.0 }
 0xc6e   : > { %1623 = vadd.xlane.f32.xlu2 %v1622_v44  ;;  %1784 = vmatpush.bf16.msra.mxu1 %v2145_v38 }
 0xc72   : > { %1785 = vmatpush.bf16.msra.mxu1 %v2144_v39 }
 0xc76   : > { %1786 = vmatpush.bf16.msra.mxu1 %v2143_v54 }
 0xcd9   : > { %v1621_v4 = vpop.xlane.xlu0 %1620 }
 0xcda   : > { %v1632_v49 = vmul.f32 %v2704_v48, %v1621_v4 }
 0xcdc   : > { %v1634_v50 = vsub.f32 %v1617_v40, %v1632_v49 }
 0xcde   : > { %v1636_v51 = vmul.f32 %v1634_v50, %v1634_v50 }
 0xce0   : > { %v1638_v52 = vsel %vm515_vm9, %v1636_v51, 0.0 }
 0xce1   : > { %v1624_v53 = vpop.xlane.xlu2 %1623  ;;  %1639 = vadd.xlane.f32.xlu1 %v1638_v52 }
 0xce2   : > { %v1633_v16 = vmul.f32 %v2704_v48, %v1624_v53 }
 0xce4   : > { %v1635_v56 = vsub.f32 %v1618_v62, %v1633_v16 }
 0xce6   : > { %v1637_v57 = vmul.f32 %v1635_v56, %v1635_v56 }
 0xce8   : > { %v1641_v59 = vsel %vm515_vm9, %v1637_v57, 0.0 }
 0xce9   : > { %1642 = vadd.xlane.f32.xlu0 %v1641_v59 }
 0xd54   : > { %v1640_v63 = vpop.xlane.xlu1 %1639 }
 0xd55   : > { %v1644_v6 = vmul.f32 %v1640_v63, %v2704_v48 }
 0xd57   : > { %v1646_v8 = vadd.f32 1e-05, %v1644_v6 }
 0xd59   : > { %2266 = vrsqrt.f32 %v1646_v8  ;;  %vm1654_vm3 = vweird.f32 %v1646_v8 }
 0xd5c   : > { %v1643_v10 = vpop.xlane.xlu0 %1642 }
 0xd5d   : > { %v1645_v20 = vmul.f32 %v1643_v10, %v2704_v48 }
 0xd5f   : > { %v2267_v25 = vpop.eup %2266  ;;  %v1647_v11 = vadd.f32 1e-05, %v1645_v20 }
 0xd60   : > { %v1649_v2 = vmul.f32 %v2267_v25, %v1646_v8  ;;  %vm1655_vm2 = vweird.f32 %v2267_v25 }
 0xd61   : > { %2268 = vrsqrt.f32 %v1647_v11  ;;  %vm1656_vm4 = vmor %vm1654_vm3, %vm1655_vm2  ;;  %vm1664_vm6 = vweird.f32 %v1647_v11 }
 0xd62   : > { %v1650_v13 = vmul.f32 %v2267_v25, %v1649_v2 }
 0xd64   : > { %v1651_v14 = vmul.f32 0.5, %v1650_v13 }
 0xd66   : > { %v1652_v19 = vsub.f32 1.5, %v1651_v14 }
 0xd67   : > { %v2269_v24 = vpop.eup %2268 }
 0xd68   : > { %v1653_v26 = vmul.f32 %v2267_v25, %v1652_v19  ;;  %v1659_v27 = vmul.f32 %v2269_v24, %v1647_v11  ;;  %vm1665_vm5 = vweird.f32 %v2269_v24 }
 0xd69   : > { %vm1666_vm7 = vmor %vm1664_vm6, %vm1665_vm5 }
 0xd6a   : > { %v1660_v45 = vmul.f32 %v2269_v24, %v1659_v27  ;;  %v1657_v30 = vsel %vm1656_vm4, %v2267_v25, %v1653_v26  ;;  %v1839_v26 = vperm.slane %v2719_v29, 6 }
 0xd6b   : > { %v1668_v31 = vmul.f32 %v1657_v30, %v1634_v50  ;;  %v1842_v30 = vperm.slane %v2719_v29, 7 }
 0xd6c   : > { %v1661_v18 = vmul.f32 0.5, %v1660_v45 }
 0xd6d   : > { %v1671_v3 = vmul.f32 %v1670_v61, %v1668_v31 }
 0xd6e   : > { %v1662_v28 = vsub.f32 1.5, %v1661_v18 }
 0xd6f   : > { %v1674_v35 = vadd.f32 %v1673_v33, %v1671_v3 }
 0xd70   : > { %v1663_v15 = vmul.f32 %v2269_v24, %v1662_v28 }
 0xd72   : > { %v1667_v32 = vsel %vm1666_vm7, %v2269_v24, %v1663_v15 }
 0xd73   : > { %v1669_v34 = vmul.f32 %v1667_v32, %v1635_v56 }
 0xd75   : > { %v1672_v55 = vmul.f32 %v1670_v61, %v1669_v34 }
 0xd77   : > { %v1675_v36 = vadd.f32 %v1673_v33, %v1672_v55 }
 0xd79   : > { %v1676_v37 = vpack.c.bf16 %v1675_v36, %v1674_v35 }
 0xd7b   : > { %2093 = vmatmul.msk.bf16.vlgmr.msrb.gmra.mxu3 %vm515_vm9, %v1676_v37 }
 0xdfe   : > { %v1706_v40 = vpop.f32.mrf.mxu3 }
 0xdff   : > { %v1707_v7 = vadd.f32 %v1706_v40, %v1681_v41 }
 0xe01   : > { %v1711_v62 = vmax.f32 %v1707_v7, 0.0 }
 0xe06   : > { %v1708_v42 = vpop.f32.mrf.mxu3 }
 0xe07   : > { %v1709_v43 = vadd.f32 %v1708_v42, %v1681_v41 }
 0xe09   : > { %v1712_v44 = vmax.f32 %v1709_v43, 0.0 }
 0xe0b   : > { %v1713_v22 = vpack.c.bf16 %v1712_v44, %v1711_v62 }
 0xe0d   : > { %1787 = vmatmul.bf16.vlgmr.msra.gmra.mxu1 %v1713_v22 }
 0xe8a   : > { %v1788_v58 = vpop.f32.mrf.mxu1 }
 0xe8b   : > { %v1789_v1 = vadd.f32 %v1788_v58, %v1730_v46 }
 0xe8d   : > { %v1793_v0 = vadd.f32 %v1789_v1, %v1674_v35 }
 0xe8f   : > { %v1795_v47 = vsel %vm515_vm9, %v1793_v0, 0.0 }
 0xe90   : > { %1796 = vadd.xlane.f32.xlu2 %v1795_v47 }
 0xe92   : > { %v1790_v4 = vpop.f32.mrf.mxu1 }
 0xe93   : > { %v1791_v49 = vadd.f32 %v1790_v4, %v1730_v46 }
 0xe95   : > { %v1794_v50 = vadd.f32 %v1791_v49, %v1675_v36 }
 0xe97   : > { %v1798_v51 = vsel %vm515_vm9, %v1794_v50, 0.0 }
 0xe98   : > { %1799 = vadd.xlane.f32.xlu1 %v1798_v51 }
 0xf03   : > { %v1797_v52 = vpop.xlane.xlu2 %1796 }
 0xf04   : > { %v1801_v53 = vmul.f32 %v1797_v52, %v2704_v48 }
 0xf06   : > { %v1803_v16 = vsub.f32 %v1793_v0, %v1801_v53 }
 0xf08   : > { %v1805_v56 = vmul.f32 %v1803_v16, %v1803_v16 }
 0xf0a   : > { %v1807_v57 = vsel %vm515_vm9, %v1805_v56, 0.0 }
 0xf0b   : > { %v1800_v59 = vpop.xlane.xlu1 %1799  ;;  %1808 = vadd.xlane.f32.xlu0 %v1807_v57 }
 0xf0c   : > { %v1802_v60 = vmul.f32 %v1800_v59, %v2704_v48 }
 0xf0e   : > { %v1804_v63 = vsub.f32 %v1794_v50, %v1802_v60 }
 0xf10   : > { %v1806_v6 = vmul.f32 %v1804_v63, %v1804_v63 }
 0xf12   : > { %v1810_v8 = vsel %vm515_vm9, %v1806_v6, 0.0 }
 0xf13   : > { %1811 = vadd.xlane.f32.xlu2 %v1810_v8 }
 0xf7e   : > { %v1809_v9 = vpop.xlane.xlu0 %1808 }
 0xf7f   : > { %v1813_v23 = vmul.f32 %v1809_v9, %v2704_v48 }
 0xf81   : > { %v1815_v10 = vadd.f32 1e-05, %v1813_v23 }
 0xf83   : > { %2270 = vrsqrt.f32 %v1815_v10  ;;  %vm1823_vm10 = vweird.f32 %v1815_v10 }
 0xf86   : > { %v1812_v20 = vpop.xlane.xlu2 %1811 }
 0xf87   : > { %v1814_v21 = vmul.f32 %v1812_v20, %v2704_v48 }
 0xf89   : > { %v2271_v25 = vpop.eup %2270  ;;  %v1816_v11 = vadd.f32 1e-05, %v1814_v21 }
 0xf8a   : > { %v1818_v2 = vmul.f32 %v2271_v25, %v1815_v10  ;;  %vm1824_vm8 = vweird.f32 %v2271_v25 }
 0xf8b   : > { %2272 = vrsqrt.f32 %v1816_v11  ;;  %vm1825_vm11 = vmor %vm1823_vm10, %vm1824_vm8  ;;  %vm1833_vm13 = vweird.f32 %v1816_v11 }
 0xf8c   : > { %v1819_v12 = vmul.f32 %v2271_v25, %v1818_v2 }
 0xf8e   : > { %v1820_v13 = vmul.f32 0.5, %v1819_v12 }
 0xf90   : > { %v1821_v14 = vsub.f32 1.5, %v1820_v13 }
 0xf91   : > { %v2273_v17 = vpop.eup %2272 }
 0xf92   : > { %v1822_v19 = vmul.f32 %v2271_v25, %v1821_v14  ;;  %v1828_v24 = vmul.f32 %v2273_v17, %v1816_v11  ;;  %vm1834_vm12 = vweird.f32 %v2273_v17 }
 0xf93   : > { %vm1835_vm14 = vmor %vm1833_vm13, %vm1834_vm12 }
 0xf94   : > { %v1826_v27 = vsel %vm1825_vm11, %v2271_v25, %v1822_v19  ;;  %v1829_v45 = vmul.f32 %v2273_v17, %v1828_v24 }
 0xf95   : > { %v1837_v48 = vmul.f32 %v1826_v27, %v1803_v16 }
 0xf96   : > { %v1830_v18 = vmul.f32 0.5, %v1829_v45 }
 0xf97   : > { %v1840_v28 = vmul.f32 %v1839_v26, %v1837_v48 }
 0xf98   : > { %v1831_v61 = vsub.f32 1.5, %v1830_v18 }
 0xf99   : > { %v1843_v31 = vadd.f32 %v1842_v30, %v1840_v28 }
 0xf9a   : > { %v1832_v15 = vmul.f32 %v2273_v17, %v1831_v61 }
 0xf9b   : > { %1845 = vst.msk [vmem:[#allocation2] sm:$0xff] %vm515_vm9, %v1843_v31 }
 0xf9c   : > { %v1836_v32 = vsel %vm1835_vm14, %v2273_v17, %v1832_v15 }
 0xf9d   : > { %v1838_v33 = vmul.f32 %v1836_v32, %v1804_v63 }
 0xf9f   : > { %v1841_v3 = vmul.f32 %v1839_v26, %v1838_v33  ;;  %1850 = sbr.rel (%p2126_p5) target bundleno = 4151 (0x1037), region = 64 }
 0xfa1   : > { %v1844_v34 = vadd.f32 %v1842_v30, %v1841_v3 }
 0xfa3   : > { %1846 = vst.msk [vmem:[#allocation2 + $0x8] sm:$0xff] %vm515_vm9, %v1844_v34 }
 0xfa4   : > { %v1876_v29 = vld [vmem:[%s2774_s8 + $0x18] sm:$0xff]  ;;  %v1875_v55 = vld [vmem:[%s2774_s8 + $0x10] sm:$0xff]  ;;  %v1852_v35 = vrot.slane %v1843_v31, 2  ;;  %v1855_v36 = vrot.slane %v1843_v31, 4  ;;  %v1874_v37 = vld [vmem:[%s2774_s8 + $0x8] sm:$0xff]  ;;  %v1858_v38 = vrot.slane %v1843_v31, 6 }
 0xfa5   : > { %1894 = vmatpush.msra.mxu0 %v1876_v29  ;;  %v1873_v39 = vld [vmem:[%s2774_s8] sm:$0xff]  ;;  %v1863_v41 = vrot.slane %v1844_v34, 2  ;;  %v1866_v42 = vrot.slane %v1844_v34, 4  ;;  %v1869_v62 = vrot.slane %v1844_v34, 6  ;;  %vm1902_vm15 = vcmask 25600  }
 0xfa6   : > { %v1854_v5 = vadd.f32 %v1852_v35, %v1843_v31  ;;  %v2277_v58 = vld [vmem:[%s2774_s8 + $0x20] ss:$0 sm:$0xff] }
 0xfa7   : > { %1895 = vmatpush.msra.mxu0 %v1875_v55 }
 0xfa8   : > { %v1857_v54 = vadd.f32 %v1855_v36, %v1854_v5 }
 0xfa9   : > { %1896 = vmatpush.msra.mxu0 %v1874_v37 }
 0xfaa   : > { %v1860_v40 = vadd.f32 %v1858_v38, %v1857_v54 }
 0xfab   : > { %1897 = vmatpush.msra.mxu0 %v1873_v39 }
 0xfac   : > { %v1861_v7 = vadd.f32 %v1860_v40, %v1844_v34 }
 0xfae   : > { %v1865_v43 = vadd.f32 %v1863_v41, %v1861_v7 }
 0xfb0   : > { %v1868_v44 = vadd.f32 %v1866_v42, %v1865_v43 }
 0xfb2   : > { %v1871_v22 = vadd.f32 %v1869_v62, %v1868_v44 }
 0xfb4   : > { %v1872_v46 = vmul.f32 0.125, %v1871_v22 }
 0xfb6   : > { %2127 = vmatmul.msk.f32.vlgmr.msra.gmra.mxu0 %vm515_vm9, %v1872_v46 }
0x1033   : > { %v1899_v1 = vpop.f32.mrf.mxu0 }
0x1034   : > { %v1900_v0 = vadd.f32 %v2277_v58, %v1899_v1 }
0x1036   : > { %1903 = vst.msk [vmem:[#allocation3] sm:$0x3] %vm1902_vm15, %v1900_v0 }
0x1037 PF: > { %p2155_p6 = scmp.eq.s32.totalorder %s2383_s10, 1  ;;  %s2326_s13 = smov [#allocation3]  }
0x1038   : > { %s1910_s11 = sshll.u32 %s2326_s13, 4  ;;  %s1912_s23 = sshll.u32 %s2775_s9, 4  ;;  %s1911_s11 = int_to_ptr.vmem [resolvable:$true] %s1910_s11  ;;  %s1913_s23 = int_to_ptr.hbm [resolvable:$true] %s1912_s23 }
0x1039   : > { %2152 = dma.vmem_to_hbm [thread:$0]  (%p2155_p6), %s1911_s11, 32, %s1913_s23, [#allocation4]  }
0x103a   : > { %2311 = dma.done.wait (%p2155_p6), [#allocation4], 32  }
0x103b   : > { %2313 = vsyncadd (%p2155_p6), [#allocation4], 4294967264 }
0x103c PF: > { %s20_s30 = sadd.s32 1, %s2316_s30  }
0x103d   : > { %p17_p7 = scmp.ge.s32.totalorder %s20_s30, 4  }
0x103f   :  { %19 = sbr.rel (!%p17_p7) target bundleno = 1 (0x1), region = 103 }
0x1044   :  { %1926 = vsyncpa [#allocation4], 1 }
0x1045   :  { %1928 = vsyncpa [#allocation4 + $0x1], 1 }

</bundles_post_ra>
